<compile_context>
chip_gen: v5e
topology: v5e:2x2
jax: 0.10.0
libtpu: 0.0.40
codegen_flags: <defaults>
</compile_context>

<pallas_src>
import functools

import numpy as np
import jax
import jax.numpy as jnp
from jax.experimental import pallas as pl
from jax.experimental.pallas import tpu as pltpu


# ----------------------------------------------------------------------------
# Trace-time constants (numpy -> constant folded)
# ----------------------------------------------------------------------------
def _round_up(x, m):
    return ((x + m - 1) // m) * m


def _bilinear_matrix(n_in, n_out):
    """Interpolation matrix A (n_out, n_in) for align_corners=True."""
    if n_in == 1:
        return np.ones((n_out, 1), np.float32)
    src = np.arange(n_out, dtype=np.float64) * (n_in - 1) / (n_out - 1)
    i0 = np.clip(np.floor(src).astype(np.int64), 0, n_in - 2)
    frac = src - i0
    A = np.zeros((n_out, n_in), np.float64)
    rows = np.arange(n_out)
    A[rows, i0] += 1.0 - frac
    A[rows, i0 + 1] += frac
    return A.astype(np.float32)


def _height_taps(H, Ho):
    """(i0, frac) per output row: the bilinear matrix is 2-sparse per row."""
    if H == 1:
        return tuple([0] * Ho), tuple([0.0] * Ho)
    src = np.arange(Ho, dtype=np.float64) * (H - 1) / (Ho - 1)
    i0 = np.clip(np.floor(src).astype(np.int64), 0, H - 2)
    frac = (src - i0).astype(np.float32)
    return tuple(int(i) for i in i0), tuple(float(f) for f in frac)


def _tap_masks(Ho, Wo):
    """(9, Ho*Wo) f32 masks: 1.0 where the 3x3 tap's source pixel is in-bounds."""
    ys, xs = np.meshgrid(np.arange(Ho), np.arange(Wo), indexing="ij")
    masks = []
    for dy in (-1, 0, 1):
        for dx in (-1, 0, 1):
            m = (ys + dy >= 0) & (ys + dy < Ho) & (xs + dx >= 0) & (xs + dx < Wo)
            masks.append(m.reshape(-1))
    return np.stack(masks).astype(np.float32)


# ----------------------------------------------------------------------------
# Fused kernel: upsample + concat + (conv3x3 + BN + ReLU) x 2, per batch image
# ----------------------------------------------------------------------------
def _up_kernel(x1_ref, x2_ref, awT_ref, mask_ref,
               w1_ref, b1_ref, w2_ref, b2_ref,
               o_ref, xw_buf, xin_buf,
               *, C1, Cin1p, Coutp, H, Ho, Wo, h_idx, h_frac):
    # x1_ref:  (1, C1*H, W)            x2_ref: (1, C1, Ho*Wo)
    # awT_ref: (W, Wo) f32             mask_ref: (9, Ho*Wo) f32
    # w1_ref:  (9*Coutp, Cin1p) bf16   w2_ref: (9*Coutp, Coutp) bf16
    # b*_ref:  (Coutp, 1) f32          o_ref: (1, Coutp, Ho*Wo) f32
    # scratch: xw_buf (C1*H, Wo) f32,  xin_buf (Cin1p, Ho*Wo) f32
    Np = Ho * Wo

    # ---- (1) separable bilinear x2 upsample of x1 ---------------------------
    # Width pass: one 2-D MXU matmul over all channels/rows (kept f32: tiny).
    xw_buf[...] = jnp.dot(x1_ref[0], awT_ref[...],
                          preferred_element_type=jnp.float32)     # (C1*H, Wo)
    # Height pass: 2-tap VPU blend per output row; rows h=i0 of every channel
    # are gathered with a strided pl.ds load and the result lands directly in
    # the concat buffer (rows C1:2*C1) in flattened (Ho*Wo) lane order.
    for ho in range(Ho):
        i0 = h_idx[ho]
        f = h_frac[ho]
        a = xw_buf[pl.ds(i0, C1, stride=H), :]         # (C1, Wo)
        b = xw_buf[pl.ds(i0 + 1, C1, stride=H), :]     # (C1, Wo)
        xin_buf[C1:2 * C1, ho * Wo:(ho + 1) * Wo] = (1.0 - f) * a + f * b

    # ---- (2) fused channel concat [x2, up(x1)] ------------------------------
    xin_buf[0:C1, :] = x2_ref[0]
    if Cin1p > 2 * C1:
        # Zero only the padded K rows, every step: cheap (few KiB) and keeps
        # each TensorCore's private scratch initialized under megacore
        # sharding of the "parallel" batch axis (a pid==0-only init would
        # leave the other core's scratch uninitialized).
        xin_buf[2 * C1:Cin1p, :] = jnp.zeros((Cin1p - 2 * C1, Np), jnp.float32)

    # ---- (3)/(4) two (3x3 conv + folded BN + ReLU), tap-accumulated ---------
    def conv3x3(src, w_ref, b_ref):
        acc = jnp.zeros((Coutp, Np), jnp.float32)
        t = 0
        for dy in (-1, 0, 1):
            for dx in (-1, 0, 1):
                off = dy * Wo + dx
                if off == 0:
                    s = src
                else:
                    # roll + boundary mask in f32 (VPU); only the MXU operands
                    # are bf16 (v5e has no bf16 VPU).
                    s = jnp.roll(src, -off, axis=1) * mask_ref[t:t + 1, :]
                w_tap = w_ref[t * Coutp:(t + 1) * Coutp, :]        # bf16
                acc = acc + jnp.dot(w_tap, s.astype(jnp.bfloat16),
                                    preferred_element_type=jnp.float32)
                t += 1
        return jnp.maximum(acc + b_ref[...], 0.0)      # f32 epilogue

    h = conv3x3(xin_buf[...], w1_ref, b1_ref)          # (Coutp, Np); padded
    out = conv3x3(h, w2_ref, b2_ref)                   #   rows are exactly 0
    o_ref[0] = out.astype(o_ref.dtype)                 # full unmasked store


# ----------------------------------------------------------------------------
# up.forward
# ----------------------------------------------------------------------------
def up_forward(x1, x2, params):
    """x1: (N, in_ch//2, H, W), x2: (N, in_ch//2, ~2H, ~2W), NCHW float32."""
    N, C1, H, W = x1.shape
    Ho, Wo = 2 * H, 2 * W
    Cout, Coutp, Cin1p = params["cout"], params["coutp"], params["cin1p"]
    assert Cin1p >= 2 * C1 and Coutp >= Cout

    # F.pad(x2, (diffX//2, int(diffX/2), diffY//2, int(diffY/2))) — replicates
    # the original module's argument ordering exactly (height diff applied to
    # width and vice versa).  No-op when shapes already match.
    diffX = Ho - x2.shape[2]
    diffY = Wo - x2.shape[3]
    if diffX != 0 or diffY != 0:
        x2 = jnp.pad(x2, ((0, 0), (0, 0),
                          (diffY // 2, int(diffY / 2)),
                          (diffX // 2, int(diffX / 2))))

    # Free row-major reshapes — no data movement in HBM.
    x1_r = x1.reshape(N, C1 * H, W)
    x2_flat = x2.reshape(N, C1, Ho * Wo)

    awT = jnp.asarray(_bilinear_matrix(W, Wo).T)      # (W, Wo) f32, ~KiB
    masks = jnp.asarray(_tap_masks(Ho, Wo))           # (9, Ho*Wo) f32
    h_idx, h_frac = _height_taps(H, Ho)

    kernel = functools.partial(
        _up_kernel, C1=C1, Cin1p=Cin1p, Coutp=Coutp,
        H=H, Ho=Ho, Wo=Wo, h_idx=h_idx, h_frac=h_frac)

    Np = Ho * Wo
    flops = N * (2 * C1 * H * W * Wo + 3 * C1 * Np
                 + 2 * 9 * Coutp * Cin1p * Np + 2 * 9 * Coutp * Coutp * Np)
    bytes_accessed = (x1_r.size * 4 + x2_flat.size * 4 + N * Coutp * Np * 4
                      + awT.size * 4 + masks.size * 4
                      + params["w1"].size * 2 + params["w2"].size * 2
                      + params["b1"].size * 4 + params["b2"].size * 4)

    out_flat = pl.pallas_call(
        kernel,
        out_shape=jax.ShapeDtypeStruct((N, Coutp, Np), jnp.float32),
        grid=(N,),
        in_specs=[
            pl.BlockSpec((1, C1 * H, W), lambda n: (n, 0, 0)),   # x1
            pl.BlockSpec((1, C1, Np), lambda n: (n, 0, 0)),      # x2
            pl.BlockSpec((W, Wo), lambda n: (0, 0)),             # A_w^T
            pl.BlockSpec((9, Np), lambda n: (0, 0)),             # tap masks
            pl.BlockSpec((9 * Coutp, Cin1p), lambda n: (0, 0)),  # w1 (bf16)
            pl.BlockSpec((Coutp, 1), lambda n: (0, 0)),          # b1
            pl.BlockSpec((9 * Coutp, Coutp), lambda n: (0, 0)),  # w2 (bf16)
            pl.BlockSpec((Coutp, 1), lambda n: (0, 0)),          # b2
        ],
        out_specs=pl.BlockSpec((1, Coutp, Np), lambda n: (n, 0, 0)),
        scratch_shapes=[
            pltpu.VMEM((C1 * H, Wo), jnp.float32),    # width-pass staging
            pltpu.VMEM((Cin1p, Np), jnp.float32),     # concat buffer
        ],
        compiler_params=pltpu.CompilerParams(
            dimension_semantics=("parallel",),
            vmem_limit_bytes=16 * 1024 * 1024),
        cost_estimate=pl.CostEstimate(flops=int(flops), transcendentals=0,
                                      bytes_accessed=int(bytes_accessed)),
    )(x1_r, x2_flat, awT, masks,
      params["w1"], params["b1"], params["w2"], params["b2"])

    out = out_flat[:, :Cout, :] if Coutp != Cout else out_flat
    return out.reshape(N, Cout, Ho, Wo)


# ----------------------------------------------------------------------------
# Parameters (eval-mode BN folded into weights/bias at trace time)
# ----------------------------------------------------------------------------
def init_params(key, in_ch, out_ch):
    ks = jax.random.split(key, 8)

    def layer(kw, kb, kg, kbt, cin, cout):
        return dict(
            w=0.1 * jax.random.normal(kw, (cout, cin, 3, 3), jnp.float32),
            b=0.1 * jax.random.normal(kb, (cout,), jnp.float32),
            gamma=1.0 + 0.1 * jax.random.normal(kg, (cout,), jnp.float32),
            beta=0.1 * jax.random.normal(kbt, (cout,), jnp.float32),
            mean=jnp.zeros((cout,), jnp.float32),
            var=jnp.ones((cout,), jnp.float32),
        )

    return dict(layer1=layer(ks[0], ks[1], ks[2], ks[3], in_ch, out_ch),
                layer2=layer(ks[4], ks[5], ks[6], ks[7], out_ch, out_ch))


def fold_params(raw, eps=1e-5):
    cout = int(raw["layer1"]["w"].shape[0])
    cin1 = int(raw["layer1"]["w"].shape[1])
    coutp = _round_up(cout, 16)     # bf16 sublane alignment for M / output
    cin1p = _round_up(cin1, 16)     # bf16 sublane alignment for conv-1 K

    def fold(layer, cinp):
        w, b = layer["w"], layer["b"]
        co, ci = w.shape[0], w.shape[1]
        scale = layer["gamma"] / jnp.sqrt(layer["var"] + eps)
        w_s = w * scale[:, None, None, None]                 # fold BN in f32
        # (co, ci, 3, 3) -> (9, co, ci); tap order (ky, kx) == kernel's (dy, dx)
        w_t = jnp.transpose(w_s, (2, 3, 0, 1)).reshape(9, co, ci)
        w_pad = jnp.zeros((9, coutp, cinp), jnp.float32).at[:, :co, :ci].set(w_t)
        bias = (b - layer["mean"]) * scale + layer["beta"]
        b_pad = jnp.zeros((coutp, 1), jnp.float32).at[:co, 0].set(bias)
        # (9, Coutp, K) -> (9*Coutp, K): per-tap contiguous row blocks (bf16).
        return w_pad.reshape(9 * coutp, cinp).astype(jnp.bfloat16), b_pad

    w1, b1 = fold(raw["layer1"], cin1p)
    w2, b2 = fold(raw["layer2"], coutp)
    return dict(w1=w1, b1=b1, w2=w2, b2=b2,
                cout=cout, coutp=coutp, cin1p=cin1p)


# ----------------------------------------------------------------------------
# Pure-JAX reference for correctness checking
# ----------------------------------------------------------------------------
def up_forward_ref(x1, x2, raw, eps=1e-5):
    N, C1, H, W = x1.shape
    Ho, Wo = 2 * H, 2 * W
    A_h = jnp.asarray(_bilinear_matrix(H, Ho))
    A_w = jnp.asarray(_bilinear_matrix(W, Wo))
    x1u = jnp.einsum("oh,nchw,pw->ncop", A_h, x1, A_w)

    diffX = Ho - x2.shape[2]
    diffY = Wo - x2.shape[3]
    x2p = jnp.pad(x2, ((0, 0), (0, 0),
                       (diffY // 2, int(diffY / 2)),
                       (diffX // 2, int(diffX / 2))))
    x = jnp.concatenate([x2p, x1u], axis=1)

    def conv_bn_relu(x, layer):
        y = jax.lax.conv_general_dilated(
            x, layer["w"], window_strides=(1, 1), padding="SAME",
            dimension_numbers=("NCHW", "OIHW", "NCHW"))
        y = y + layer["b"][None, :, None, None]
        scale = layer["gamma"] / jnp.sqrt(layer["var"] + eps)
        shift = layer["beta"] - layer["mean"] * scale
        y = y * scale[None, :, None, None] + shift[None, :, None, None]
        return jnp.maximum(y, 0.0)

    x = conv_bn_relu(x, raw["layer1"])
    x = conv_bn_relu(x, raw["layer2"])
    return x


if __name__ == "__main__":
    key = jax.random.PRNGKey(0)
    k1, k2, kp = jax.random.split(key, 3)

    N, in_ch, out_ch = 2, 8, 4
    H, W = 8, 8                       # x1 spatial; upsampled to 16x16
    x1 = jax.random.normal(k1, (N, in_ch // 2, H, W), jnp.float32)
    x2 = jax.random.normal(k2, (N, in_ch // 2, 2 * H, 2 * W), jnp.float32)

    raw = init_params(kp, in_ch, out_ch)
    params = fold_params(raw)

    fwd = jax.jit(functools.partial(up_forward, params=params))
    y = fwd(x1, x2)
    jax.block_until_ready(y)

    assert y.shape == (N, out_ch, 2 * H, 2 * W), y.shape
    assert bool(jnp.all(jnp.isfinite(y)))

    y_ref = up_forward_ref(x1, x2, raw)
    # bf16 MXU operands (f32 accumulation) -> looser tolerance vs f32 reference.
    err = float(jnp.max(jnp.abs(y - y_ref)))
    assert bool(jnp.allclose(y, y_ref, atol=5e-2, rtol=5e-2)), err

    print("KERNEL_OK")
</pallas_src>

<mosaic_0001>
module attributes {stable_mosaic.version = 11 : i64} {
  func.func @_up_kernel(%arg0: i32, %arg1: memref<1x32x8xf32, #tpu.memory_space<vmem>>, %arg2: memref<1x4x256xf32, #tpu.memory_space<vmem>>, %arg3: memref<8x16xf32, #tpu.memory_space<vmem>>, %arg4: memref<9x256xf32, #tpu.memory_space<vmem>>, %arg5: memref<144x16xbf16, #tpu.memory_space<vmem>>, %arg6: memref<16x1xf32, #tpu.memory_space<vmem>>, %arg7: memref<144x16xbf16, #tpu.memory_space<vmem>>, %arg8: memref<16x1xf32, #tpu.memory_space<vmem>>, %arg9: memref<1x16x256xf32, #tpu.memory_space<vmem>>, %arg10: memref<32x16xf32, #tpu.memory_space<vmem>>, %arg11: memref<16x256xf32, #tpu.memory_space<vmem>>) attributes {dimension_semantics = [#tpu.dimension_semantics<parallel>], iteration_bounds = array<i64: 2>, scalar_prefetch = 0 : i64, scratch_operands = 2 : i64, tpu.core_type = #tpu.core_type<tc>, window_params = [{transform_indices = @transform_0, window_bounds = array<i64: 1, 32, 8>}, {transform_indices = @transform_1, window_bounds = array<i64: 1, 4, 256>}, {pipeline_mode = #tpu.pipeline_mode<synchronous>, transform_indices = @transform_2, window_bounds = array<i64: 8, 16>}, {pipeline_mode = #tpu.pipeline_mode<synchronous>, transform_indices = @transform_3, window_bounds = array<i64: 9, 256>}, {pipeline_mode = #tpu.pipeline_mode<synchronous>, transform_indices = @transform_4, window_bounds = array<i64: 144, 16>}, {pipeline_mode = #tpu.pipeline_mode<synchronous>, transform_indices = @transform_5, window_bounds = array<i64: 16, 1>}, {pipeline_mode = #tpu.pipeline_mode<synchronous>, transform_indices = @transform_6, window_bounds = array<i64: 144, 16>}, {pipeline_mode = #tpu.pipeline_mode<synchronous>, transform_indices = @transform_7, window_bounds = array<i64: 16, 1>}, {transform_indices = @transform_8, window_bounds = array<i64: 1, 16, 256>}]} {
    %c0 = arith.constant 0 : index
    %c0_0 = arith.constant 0 : index
    %c0_1 = arith.constant 0 : index
    %0 = vector.load %arg1[%c0, %c0_0, %c0_1] : memref<1x32x8xf32, #tpu.memory_space<vmem>>, vector<1x32x8xf32>
    %1 = vector.shape_cast %0 : vector<1x32x8xf32> to vector<32x8xf32>
    %c0_2 = arith.constant 0 : index
    %c0_3 = arith.constant 0 : index
    %2 = vector.load %arg3[%c0_2, %c0_3] : memref<8x16xf32, #tpu.memory_space<vmem>>, vector<8x16xf32>
    %cst = arith.constant dense<0.000000e+00> : vector<32x16xf32>
    %3 = tpu.matmul %1, %2, %cst {dimension_numbers = #tpu.dot_dimension_numbers<[1], [0], [0], [1], [0, 0, 1, 1], [], []>} : vector<32x8xf32>, vector<8x16xf32>, vector<32x16xf32> -> vector<32x16xf32>
    %c0_4 = arith.constant 0 : index
    %c0_5 = arith.constant 0 : index
    %4 = vector.load %arg10[%c0_4, %c0_5] : memref<32x16xf32, #tpu.memory_space<vmem>>, vector<32x16xf32>
    tpu.vector_store %arg10[%c0_4, %c0_5], %3 {strides = array<i32>} : memref<32x16xf32, #tpu.memory_space<vmem>>, vector<32x16xf32>,
    %c0_6 = arith.constant 0 : index
    %c0_7 = arith.constant 0 : index
    %5 = tpu.strided_load %arg10[%c0_6, %c0_7] {strides = array<i32: 8, 1>} : memref<32x16xf32, #tpu.memory_space<vmem>>, vector<4x16xf32>
    %c1 = arith.constant 1 : index
    %c0_8 = arith.constant 0 : index
    %6 = tpu.strided_load %arg10[%c1, %c0_8] {strides = array<i32: 8, 1>} : memref<32x16xf32, #tpu.memory_space<vmem>>, vector<4x16xf32>
    %cst_9 = arith.constant 1.000000e+00 : f32
    %7 = vector.broadcast %cst_9 : f32 to vector<4x16xf32>
    %8 = arith.mulf %7, %5 : vector<4x16xf32>
    %cst_10 = arith.constant 0.000000e+00 : f32
    %9 = vector.broadcast %cst_10 : f32 to vector<4x16xf32>
    %10 = arith.mulf %9, %6 : vector<4x16xf32>
    %11 = arith.addf %8, %10 : vector<4x16xf32>
    %c4 = arith.constant 4 : index
    %c0_11 = arith.constant 0 : index
    %12 = vector.load %arg11[%c4, %c0_11] : memref<16x256xf32, #tpu.memory_space<vmem>>, vector<4x16xf32>
    tpu.vector_store %arg11[%c4, %c0_11], %11 {strides = array<i32>} : memref<16x256xf32, #tpu.memory_space<vmem>>, vector<4x16xf32>,
    %c0_12 = arith.constant 0 : index
    %c0_13 = arith.constant 0 : index
    %13 = tpu.strided_load %arg10[%c0_12, %c0_13] {strides = array<i32: 8, 1>} : memref<32x16xf32, #tpu.memory_space<vmem>>, vector<4x16xf32>
    %c1_14 = arith.constant 1 : index
    %c0_15 = arith.constant 0 : index
    %14 = tpu.strided_load %arg10[%c1_14, %c0_15] {strides = array<i32: 8, 1>} : memref<32x16xf32, #tpu.memory_space<vmem>>, vector<4x16xf32>
    %cst_16 = arith.constant 0.533333302 : f32
    %15 = vector.broadcast %cst_16 : f32 to vector<4x16xf32>
    %16 = arith.mulf %15, %13 : vector<4x16xf32>
    %cst_17 = arith.constant 0.466666669 : f32
    %17 = vector.broadcast %cst_17 : f32 to vector<4x16xf32>
    %18 = arith.mulf %17, %14 : vector<4x16xf32>
    %19 = arith.addf %16, %18 : vector<4x16xf32>
    %c4_18 = arith.constant 4 : index
    %c16 = arith.constant 16 : index
    %20 = vector.load %arg11[%c4_18, %c16] : memref<16x256xf32, #tpu.memory_space<vmem>>, vector<4x16xf32>
    tpu.vector_store %arg11[%c4_18, %c16], %19 {strides = array<i32>} : memref<16x256xf32, #tpu.memory_space<vmem>>, vector<4x16xf32>,
    %c0_19 = arith.constant 0 : index
    %c0_20 = arith.constant 0 : index
    %21 = tpu.strided_load %arg10[%c0_19, %c0_20] {strides = array<i32: 8, 1>} : memref<32x16xf32, #tpu.memory_space<vmem>>, vector<4x16xf32>
    %c1_21 = arith.constant 1 : index
    %c0_22 = arith.constant 0 : index
    %22 = tpu.strided_load %arg10[%c1_21, %c0_22] {strides = array<i32: 8, 1>} : memref<32x16xf32, #tpu.memory_space<vmem>>, vector<4x16xf32>
    %cst_23 = arith.constant 0.0666666627 : f32
    %23 = vector.broadcast %cst_23 : f32 to vector<4x16xf32>
    %24 = arith.mulf %23, %21 : vector<4x16xf32>
    %cst_24 = arith.constant 0.933333337 : f32
    %25 = vector.broadcast %cst_24 : f32 to vector<4x16xf32>
    %26 = arith.mulf %25, %22 : vector<4x16xf32>
    %27 = arith.addf %24, %26 : vector<4x16xf32>
    %c4_25 = arith.constant 4 : index
    %c32 = arith.constant 32 : index
    %28 = vector.load %arg11[%c4_25, %c32] : memref<16x256xf32, #tpu.memory_space<vmem>>, vector<4x16xf32>
    tpu.vector_store %arg11[%c4_25, %c32], %27 {strides = array<i32>} : memref<16x256xf32, #tpu.memory_space<vmem>>, vector<4x16xf32>,
    %c1_26 = arith.constant 1 : index
    %c0_27 = arith.constant 0 : index
    %29 = tpu.strided_load %arg10[%c1_26, %c0_27] {strides = array<i32: 8, 1>} : memref<32x16xf32, #tpu.memory_space<vmem>>, vector<4x16xf32>
    %c2 = arith.constant 2 : index
    %c0_28 = arith.constant 0 : index
    %30 = tpu.strided_load %arg10[%c2, %c0_28] {strides = array<i32: 8, 1>} : memref<32x16xf32, #tpu.memory_space<vmem>>, vector<4x16xf32>
    %cst_29 = arith.constant 6.000000e-01 : f32
    %31 = vector.broadcast %cst_29 : f32 to vector<4x16xf32>
    %32 = arith.mulf %31, %29 : vector<4x16xf32>
    %cst_30 = arith.constant 4.000000e-01 : f32
    %33 = vector.broadcast %cst_30 : f32 to vector<4x16xf32>
    %34 = arith.mulf %33, %30 : vector<4x16xf32>
    %35 = arith.addf %32, %34 : vector<4x16xf32>
    %c4_31 = arith.constant 4 : index
    %c48 = arith.constant 48 : index
    %36 = vector.load %arg11[%c4_31, %c48] : memref<16x256xf32, #tpu.memory_space<vmem>>, vector<4x16xf32>
    tpu.vector_store %arg11[%c4_31, %c48], %35 {strides = array<i32>} : memref<16x256xf32, #tpu.memory_space<vmem>>, vector<4x16xf32>,
    %c1_32 = arith.constant 1 : index
    %c0_33 = arith.constant 0 : index
    %37 = tpu.strided_load %arg10[%c1_32, %c0_33] {strides = array<i32: 8, 1>} : memref<32x16xf32, #tpu.memory_space<vmem>>, vector<4x16xf32>
    %c2_34 = arith.constant 2 : index
    %c0_35 = arith.constant 0 : index
    %38 = tpu.strided_load %arg10[%c2_34, %c0_35] {strides = array<i32: 8, 1>} : memref<32x16xf32, #tpu.memory_space<vmem>>, vector<4x16xf32>
    %cst_36 = arith.constant 0.133333325 : f32
    %39 = vector.broadcast %cst_36 : f32 to vector<4x16xf32>
    %40 = arith.mulf %39, %37 : vector<4x16xf32>
    %cst_37 = arith.constant 0.866666674 : f32
    %41 = vector.broadcast %cst_37 : f32 to vector<4x16xf32>
    %42 = arith.mulf %41, %38 : vector<4x16xf32>
    %43 = arith.addf %40, %42 : vector<4x16xf32>
    %c4_38 = arith.constant 4 : index
    %c64 = arith.constant 64 : index
    %44 = vector.load %arg11[%c4_38, %c64] : memref<16x256xf32, #tpu.memory_space<vmem>>, vector<4x16xf32>
    tpu.vector_store %arg11[%c4_38, %c64], %43 {strides = array<i32>} : memref<16x256xf32, #tpu.memory_space<vmem>>, vector<4x16xf32>,
    %c2_39 = arith.constant 2 : index
    %c0_40 = arith.constant 0 : index
    %45 = tpu.strided_load %arg10[%c2_39, %c0_40] {strides = array<i32: 8, 1>} : memref<32x16xf32, #tpu.memory_space<vmem>>, vector<4x16xf32>
    %c3 = arith.constant 3 : index
    %c0_41 = arith.constant 0 : index
    %46 = tpu.strided_load %arg10[%c3, %c0_41] {strides = array<i32: 8, 1>} : memref<32x16xf32, #tpu.memory_space<vmem>>, vector<4x16xf32>
    %cst_42 = arith.constant 0.666666627 : f32
    %47 = vector.broadcast %cst_42 : f32 to vector<4x16xf32>
    %48 = arith.mulf %47, %45 : vector<4x16xf32>
    %cst_43 = arith.constant 0.333333343 : f32
    %49 = vector.broadcast %cst_43 : f32 to vector<4x16xf32>
    %50 = arith.mulf %49, %46 : vector<4x16xf32>
    %51 = arith.addf %48, %50 : vector<4x16xf32>
    %c4_44 = arith.constant 4 : index
    %c80 = arith.constant 80 : index
    %52 = vector.load %arg11[%c4_44, %c80] : memref<16x256xf32, #tpu.memory_space<vmem>>, vector<4x16xf32>
    tpu.vector_store %arg11[%c4_44, %c80], %51 {strides = array<i32>} : memref<16x256xf32, #tpu.memory_space<vmem>>, vector<4x16xf32>,
    %c2_45 = arith.constant 2 : index
    %c0_46 = arith.constant 0 : index
    %53 = tpu.strided_load %arg10[%c2_45, %c0_46] {strides = array<i32: 8, 1>} : memref<32x16xf32, #tpu.memory_space<vmem>>, vector<4x16xf32>
    %c3_47 = arith.constant 3 : index
    %c0_48 = arith.constant 0 : index
    %54 = tpu.strided_load %arg10[%c3_47, %c0_48] {strides = array<i32: 8, 1>} : memref<32x16xf32, #tpu.memory_space<vmem>>, vector<4x16xf32>
    %cst_49 = arith.constant 0.199999988 : f32
    %55 = vector.broadcast %cst_49 : f32 to vector<4x16xf32>
    %56 = arith.mulf %55, %53 : vector<4x16xf32>
    %cst_50 = arith.constant 8.000000e-01 : f32
    %57 = vector.broadcast %cst_50 : f32 to vector<4x16xf32>
    %58 = arith.mulf %57, %54 : vector<4x16xf32>
    %59 = arith.addf %56, %58 : vector<4x16xf32>
    %c4_51 = arith.constant 4 : index
    %c96 = arith.constant 96 : index
    %60 = vector.load %arg11[%c4_51, %c96] : memref<16x256xf32, #tpu.memory_space<vmem>>, vector<4x16xf32>
    tpu.vector_store %arg11[%c4_51, %c96], %59 {strides = array<i32>} : memref<16x256xf32, #tpu.memory_space<vmem>>, vector<4x16xf32>,
    %c3_52 = arith.constant 3 : index
    %c0_53 = arith.constant 0 : index
    %61 = tpu.strided_load %arg10[%c3_52, %c0_53] {strides = array<i32: 8, 1>} : memref<32x16xf32, #tpu.memory_space<vmem>>, vector<4x16xf32>
    %c4_54 = arith.constant 4 : index
    %c0_55 = arith.constant 0 : index
    %62 = tpu.strided_load %arg10[%c4_54, %c0_55] {strides = array<i32: 8, 1>} : memref<32x16xf32, #tpu.memory_space<vmem>>, vector<4x16xf32>
    %cst_56 = arith.constant 0.733333349 : f32
    %63 = vector.broadcast %cst_56 : f32 to vector<4x16xf32>
    %64 = arith.mulf %63, %61 : vector<4x16xf32>
    %cst_57 = arith.constant 0.266666681 : f32
    %65 = vector.broadcast %cst_57 : f32 to vector<4x16xf32>
    %66 = arith.mulf %65, %62 : vector<4x16xf32>
    %67 = arith.addf %64, %66 : vector<4x16xf32>
    %c4_58 = arith.constant 4 : index
    %c112 = arith.constant 112 : index
    %68 = vector.load %arg11[%c4_58, %c112] : memref<16x256xf32, #tpu.memory_space<vmem>>, vector<4x16xf32>
    tpu.vector_store %arg11[%c4_58, %c112], %67 {strides = array<i32>} : memref<16x256xf32, #tpu.memory_space<vmem>>, vector<4x16xf32>,
    %c3_59 = arith.constant 3 : index
    %c0_60 = arith.constant 0 : index
    %69 = tpu.strided_load %arg10[%c3_59, %c0_60] {strides = array<i32: 8, 1>} : memref<32x16xf32, #tpu.memory_space<vmem>>, vector<4x16xf32>
    %c4_61 = arith.constant 4 : index
    %c0_62 = arith.constant 0 : index
    %70 = tpu.strided_load %arg10[%c4_61, %c0_62] {strides = array<i32: 8, 1>} : memref<32x16xf32, #tpu.memory_space<vmem>>, vector<4x16xf32>
    %cst_63 = arith.constant 0.266666651 : f32
    %71 = vector.broadcast %cst_63 : f32 to vector<4x16xf32>
    %72 = arith.mulf %71, %69 : vector<4x16xf32>
    %cst_64 = arith.constant 0.733333349 : f32
    %73 = vector.broadcast %cst_64 : f32 to vector<4x16xf32>
    %74 = arith.mulf %73, %70 : vector<4x16xf32>
    %75 = arith.addf %72, %74 : vector<4x16xf32>
    %c4_65 = arith.constant 4 : index
    %c128 = arith.constant 128 : index
    %76 = vector.load %arg11[%c4_65, %c128] : memref<16x256xf32, #tpu.memory_space<vmem>>, vector<4x16xf32>
    tpu.vector_store %arg11[%c4_65, %c128], %75 {strides = array<i32>} : memref<16x256xf32, #tpu.memory_space<vmem>>, vector<4x16xf32>,
    %c4_66 = arith.constant 4 : index
    %c0_67 = arith.constant 0 : index
    %77 = tpu.strided_load %arg10[%c4_66, %c0_67] {strides = array<i32: 8, 1>} : memref<32x16xf32, #tpu.memory_space<vmem>>, vector<4x16xf32>
    %c5 = arith.constant 5 : index
    %c0_68 = arith.constant 0 : index
    %78 = tpu.strided_load %arg10[%c5, %c0_68] {strides = array<i32: 8, 1>} : memref<32x16xf32, #tpu.memory_space<vmem>>, vector<4x16xf32>
    %cst_69 = arith.constant 8.000000e-01 : f32
    %79 = vector.broadcast %cst_69 : f32 to vector<4x16xf32>
    %80 = arith.mulf %79, %77 : vector<4x16xf32>
    %cst_70 = arith.constant 2.000000e-01 : f32
    %81 = vector.broadcast %cst_70 : f32 to vector<4x16xf32>
    %82 = arith.mulf %81, %78 : vector<4x16xf32>
    %83 = arith.addf %80, %82 : vector<4x16xf32>
    %c4_71 = arith.constant 4 : index
    %c144 = arith.constant 144 : index
    %84 = vector.load %arg11[%c4_71, %c144] : memref<16x256xf32, #tpu.memory_space<vmem>>, vector<4x16xf32>
    tpu.vector_store %arg11[%c4_71, %c144], %83 {strides = array<i32>} : memref<16x256xf32, #tpu.memory_space<vmem>>, vector<4x16xf32>,
    %c4_72 = arith.constant 4 : index
    %c0_73 = arith.constant 0 : index
    %85 = tpu.strided_load %arg10[%c4_72, %c0_73] {strides = array<i32: 8, 1>} : memref<32x16xf32, #tpu.memory_space<vmem>>, vector<4x16xf32>
    %c5_74 = arith.constant 5 : index
    %c0_75 = arith.constant 0 : index
    %86 = tpu.strided_load %arg10[%c5_74, %c0_75] {strides = array<i32: 8, 1>} : memref<32x16xf32, #tpu.memory_space<vmem>>, vector<4x16xf32>
    %cst_76 = arith.constant 0.333333313 : f32
    %87 = vector.broadcast %cst_76 : f32 to vector<4x16xf32>
    %88 = arith.mulf %87, %85 : vector<4x16xf32>
    %cst_77 = arith.constant 0.666666686 : f32
    %89 = vector.broadcast %cst_77 : f32 to vector<4x16xf32>
    %90 = arith.mulf %89, %86 : vector<4x16xf32>
    %91 = arith.addf %88, %90 : vector<4x16xf32>
    %c4_78 = arith.constant 4 : index
    %c160 = arith.constant 160 : index
    %92 = vector.load %arg11[%c4_78, %c160] : memref<16x256xf32, #tpu.memory_space<vmem>>, vector<4x16xf32>
    tpu.vector_store %arg11[%c4_78, %c160], %91 {strides = array<i32>} : memref<16x256xf32, #tpu.memory_space<vmem>>, vector<4x16xf32>,
    %c5_79 = arith.constant 5 : index
    %c0_80 = arith.constant 0 : index
    %93 = tpu.strided_load %arg10[%c5_79, %c0_80] {strides = array<i32: 8, 1>} : memref<32x16xf32, #tpu.memory_space<vmem>>, vector<4x16xf32>
    %c6 = arith.constant 6 : index
    %c0_81 = arith.constant 0 : index
    %94 = tpu.strided_load %arg10[%c6, %c0_81] {strides = array<i32: 8, 1>} : memref<32x16xf32, #tpu.memory_space<vmem>>, vector<4x16xf32>
    %cst_82 = arith.constant 0.866666674 : f32
    %95 = vector.broadcast %cst_82 : f32 to vector<4x16xf32>
    %96 = arith.mulf %95, %93 : vector<4x16xf32>
    %cst_83 = arith.constant 0.13333334 : f32
    %97 = vector.broadcast %cst_83 : f32 to vector<4x16xf32>
    %98 = arith.mulf %97, %94 : vector<4x16xf32>
    %99 = arith.addf %96, %98 : vector<4x16xf32>
    %c4_84 = arith.constant 4 : index
    %c176 = arith.constant 176 : index
    %100 = vector.load %arg11[%c4_84, %c176] : memref<16x256xf32, #tpu.memory_space<vmem>>, vector<4x16xf32>
    tpu.vector_store %arg11[%c4_84, %c176], %99 {strides = array<i32>} : memref<16x256xf32, #tpu.memory_space<vmem>>, vector<4x16xf32>,
    %c5_85 = arith.constant 5 : index
    %c0_86 = arith.constant 0 : index
    %101 = tpu.strided_load %arg10[%c5_85, %c0_86] {strides = array<i32: 8, 1>} : memref<32x16xf32, #tpu.memory_space<vmem>>, vector<4x16xf32>
    %c6_87 = arith.constant 6 : index
    %c0_88 = arith.constant 0 : index
    %102 = tpu.strided_load %arg10[%c6_87, %c0_88] {strides = array<i32: 8, 1>} : memref<32x16xf32, #tpu.memory_space<vmem>>, vector<4x16xf32>
    %cst_89 = arith.constant 0.399999976 : f32
    %103 = vector.broadcast %cst_89 : f32 to vector<4x16xf32>
    %104 = arith.mulf %103, %101 : vector<4x16xf32>
    %cst_90 = arith.constant 6.000000e-01 : f32
    %105 = vector.broadcast %cst_90 : f32 to vector<4x16xf32>
    %106 = arith.mulf %105, %102 : vector<4x16xf32>
    %107 = arith.addf %104, %106 : vector<4x16xf32>
    %c4_91 = arith.constant 4 : index
    %c192 = arith.constant 192 : index
    %108 = vector.load %arg11[%c4_91, %c192] : memref<16x256xf32, #tpu.memory_space<vmem>>, vector<4x16xf32>
    tpu.vector_store %arg11[%c4_91, %c192], %107 {strides = array<i32>} : memref<16x256xf32, #tpu.memory_space<vmem>>, vector<4x16xf32>,
    %c6_92 = arith.constant 6 : index
    %c0_93 = arith.constant 0 : index
    %109 = tpu.strided_load %arg10[%c6_92, %c0_93] {strides = array<i32: 8, 1>} : memref<32x16xf32, #tpu.memory_space<vmem>>, vector<4x16xf32>
    %c7 = arith.constant 7 : index
    %c0_94 = arith.constant 0 : index
    %110 = tpu.strided_load %arg10[%c7, %c0_94] {strides = array<i32: 8, 1>} : memref<32x16xf32, #tpu.memory_space<vmem>>, vector<4x16xf32>
    %cst_95 = arith.constant 0.933333337 : f32
    %111 = vector.broadcast %cst_95 : f32 to vector<4x16xf32>
    %112 = arith.mulf %111, %109 : vector<4x16xf32>
    %cst_96 = arith.constant 0.0666666701 : f32
    %113 = vector.broadcast %cst_96 : f32 to vector<4x16xf32>
    %114 = arith.mulf %113, %110 : vector<4x16xf32>
    %115 = arith.addf %112, %114 : vector<4x16xf32>
    %c4_97 = arith.constant 4 : index
    %c208 = arith.constant 208 : index
    %116 = vector.load %arg11[%c4_97, %c208] : memref<16x256xf32, #tpu.memory_space<vmem>>, vector<4x16xf32>
    tpu.vector_store %arg11[%c4_97, %c208], %115 {strides = array<i32>} : memref<16x256xf32, #tpu.memory_space<vmem>>, vector<4x16xf32>,
    %c6_98 = arith.constant 6 : index
    %c0_99 = arith.constant 0 : index
    %117 = tpu.strided_load %arg10[%c6_98, %c0_99] {strides = array<i32: 8, 1>} : memref<32x16xf32, #tpu.memory_space<vmem>>, vector<4x16xf32>
    %c7_100 = arith.constant 7 : index
    %c0_101 = arith.constant 0 : index
    %118 = tpu.strided_load %arg10[%c7_100, %c0_101] {strides = array<i32: 8, 1>} : memref<32x16xf32, #tpu.memory_space<vmem>>, vector<4x16xf32>
    %cst_102 = arith.constant 0.466666639 : f32
    %119 = vector.broadcast %cst_102 : f32 to vector<4x16xf32>
    %120 = arith.mulf %119, %117 : vector<4x16xf32>
    %cst_103 = arith.constant 0.533333361 : f32
    %121 = vector.broadcast %cst_103 : f32 to vector<4x16xf32>
    %122 = arith.mulf %121, %118 : vector<4x16xf32>
    %123 = arith.addf %120, %122 : vector<4x16xf32>
    %c4_104 = arith.constant 4 : index
    %c224 = arith.constant 224 : index
    %124 = vector.load %arg11[%c4_104, %c224] : memref<16x256xf32, #tpu.memory_space<vmem>>, vector<4x16xf32>
    tpu.vector_store %arg11[%c4_104, %c224], %123 {strides = array<i32>} : memref<16x256xf32, #tpu.memory_space<vmem>>, vector<4x16xf32>,
    %c6_105 = arith.constant 6 : index
    %c0_106 = arith.constant 0 : index
    %125 = tpu.strided_load %arg10[%c6_105, %c0_106] {strides = array<i32: 8, 1>} : memref<32x16xf32, #tpu.memory_space<vmem>>, vector<4x16xf32>
    %c7_107 = arith.constant 7 : index
    %c0_108 = arith.constant 0 : index
    %126 = tpu.strided_load %arg10[%c7_107, %c0_108] {strides = array<i32: 8, 1>} : memref<32x16xf32, #tpu.memory_space<vmem>>, vector<4x16xf32>
    %cst_109 = arith.constant 0.000000e+00 : f32
    %127 = vector.broadcast %cst_109 : f32 to vector<4x16xf32>
    %128 = arith.mulf %127, %125 : vector<4x16xf32>
    %cst_110 = arith.constant 1.000000e+00 : f32
    %129 = vector.broadcast %cst_110 : f32 to vector<4x16xf32>
    %130 = arith.mulf %129, %126 : vector<4x16xf32>
    %131 = arith.addf %128, %130 : vector<4x16xf32>
    %c4_111 = arith.constant 4 : index
    %c240 = arith.constant 240 : index
    %132 = vector.load %arg11[%c4_111, %c240] : memref<16x256xf32, #tpu.memory_space<vmem>>, vector<4x16xf32>
    tpu.vector_store %arg11[%c4_111, %c240], %131 {strides = array<i32>} : memref<16x256xf32, #tpu.memory_space<vmem>>, vector<4x16xf32>,
    %c0_112 = arith.constant 0 : index
    %c0_113 = arith.constant 0 : index
    %c0_114 = arith.constant 0 : index
    %133 = vector.load %arg2[%c0_112, %c0_113, %c0_114] : memref<1x4x256xf32, #tpu.memory_space<vmem>>, vector<1x4x256xf32>
    %134 = vector.shape_cast %133 : vector<1x4x256xf32> to vector<4x256xf32>
    %c0_115 = arith.constant 0 : index
    %c0_116 = arith.constant 0 : index
    %135 = vector.load %arg11[%c0_115, %c0_116] : memref<16x256xf32, #tpu.memory_space<vmem>>, vector<4x256xf32>
    tpu.vector_store %arg11[%c0_115, %c0_116], %134 {strides = array<i32>} : memref<16x256xf32, #tpu.memory_space<vmem>>, vector<4x256xf32>,
    %cst_117 = arith.constant 0.000000e+00 : f32
    %136 = vector.broadcast %cst_117 : f32 to vector<8x256xf32>
    %c8 = arith.constant 8 : index
    %c0_118 = arith.constant 0 : index
    %137 = vector.load %arg11[%c8, %c0_118] : memref<16x256xf32, #tpu.memory_space<vmem>>, vector<8x256xf32>
    tpu.vector_store %arg11[%c8, %c0_118], %136 {strides = array<i32>} : memref<16x256xf32, #tpu.memory_space<vmem>>, vector<8x256xf32>,
    %c0_119 = arith.constant 0 : index
    %c0_120 = arith.constant 0 : index
    %138 = vector.load %arg11[%c0_119, %c0_120] : memref<16x256xf32, #tpu.memory_space<vmem>>, vector<16x256xf32>
    %cst_121 = arith.constant 0.000000e+00 : f32
    %139 = vector.broadcast %cst_121 : f32 to vector<16x256xf32>
    %140 = vector.extract_strided_slice %138 {offsets = [0, 239], sizes = [16, 17], strides = [1, 1]} : vector<16x256xf32> to vector<16x17xf32>
    %141 = vector.extract_strided_slice %138 {offsets = [0, 0], sizes = [16, 239], strides = [1, 1]} : vector<16x256xf32> to vector<16x239xf32>
    %142 = tpu.concatenate %140, %141 in 1 : vector<16x17xf32>, vector<16x239xf32> -> vector<16x256xf32>
    %c0_122 = arith.constant 0 : index
    %c0_123 = arith.constant 0 : index
    %143 = vector.load %arg4[%c0_122, %c0_123] : memref<9x256xf32, #tpu.memory_space<vmem>>, vector<1x256xf32>
    %144 = vector.broadcast %143 : vector<1x256xf32> to vector<16x256xf32>
    %145 = arith.mulf %142, %144 : vector<16x256xf32>
    %c0_124 = arith.constant 0 : index
    %c0_125 = arith.constant 0 : index
    %146 = vector.load %arg5[%c0_124, %c0_125] : memref<144x16xbf16, #tpu.memory_space<vmem>>, vector<16x16xbf16>
    %147 = arith.truncf %145 : vector<16x256xf32> to vector<16x256xbf16>
    %cst_126 = arith.constant dense<0.000000e+00> : vector<16x256xf32>
    %148 = tpu.matmul %146, %147, %cst_126 {dimension_numbers = #tpu.dot_dimension_numbers<[1], [0], [0], [1], [0, 0, 1, 1], [], []>} : vector<16x16xbf16>, vector<16x256xbf16>, vector<16x256xf32> -> vector<16x256xf32>
    %149 = arith.addf %139, %148 : vector<16x256xf32>
    %150 = vector.extract_strided_slice %138 {offsets = [0, 240], sizes = [16, 16], strides = [1, 1]} : vector<16x256xf32> to vector<16x16xf32>
    %151 = vector.extract_strided_slice %138 {offsets = [0, 0], sizes = [16, 240], strides = [1, 1]} : vector<16x256xf32> to vector<16x240xf32>
    %152 = tpu.concatenate %150, %151 in 1 : vector<16x16xf32>, vector<16x240xf32> -> vector<16x256xf32>
    %c1_127 = arith.constant 1 : index
    %c0_128 = arith.constant 0 : index
    %153 = vector.load %arg4[%c1_127, %c0_128] : memref<9x256xf32, #tpu.memory_space<vmem>>, vector<1x256xf32>
    %154 = vector.broadcast %153 : vector<1x256xf32> to vector<16x256xf32>
    %155 = arith.mulf %152, %154 : vector<16x256xf32>
    %c16_129 = arith.constant 16 : index
    %c0_130 = arith.constant 0 : index
    %156 = vector.load %arg5[%c16_129, %c0_130] : memref<144x16xbf16, #tpu.memory_space<vmem>>, vector<16x16xbf16>
    %157 = arith.truncf %155 : vector<16x256xf32> to vector<16x256xbf16>
    %cst_131 = arith.constant dense<0.000000e+00> : vector<16x256xf32>
    %158 = tpu.matmul %156, %157, %cst_131 {dimension_numbers = #tpu.dot_dimension_numbers<[1], [0], [0], [1], [0, 0, 1, 1], [], []>} : vector<16x16xbf16>, vector<16x256xbf16>, vector<16x256xf32> -> vector<16x256xf32>
    %159 = arith.addf %149, %158 : vector<16x256xf32>
    %160 = vector.extract_strided_slice %138 {offsets = [0, 241], sizes = [16, 15], strides = [1, 1]} : vector<16x256xf32> to vector<16x15xf32>
    %161 = vector.extract_strided_slice %138 {offsets = [0, 0], sizes = [16, 241], strides = [1, 1]} : vector<16x256xf32> to vector<16x241xf32>
    %162 = tpu.concatenate %160, %161 in 1 : vector<16x15xf32>, vector<16x241xf32> -> vector<16x256xf32>
    %c2_132 = arith.constant 2 : index
    %c0_133 = arith.constant 0 : index
    %163 = vector.load %arg4[%c2_132, %c0_133] : memref<9x256xf32, #tpu.memory_space<vmem>>, vector<1x256xf32>
    %164 = vector.broadcast %163 : vector<1x256xf32> to vector<16x256xf32>
    %165 = arith.mulf %162, %164 : vector<16x256xf32>
    %c32_134 = arith.constant 32 : index
    %c0_135 = arith.constant 0 : index
    %166 = vector.load %arg5[%c32_134, %c0_135] : memref<144x16xbf16, #tpu.memory_space<vmem>>, vector<16x16xbf16>
    %167 = arith.truncf %165 : vector<16x256xf32> to vector<16x256xbf16>
    %cst_136 = arith.constant dense<0.000000e+00> : vector<16x256xf32>
    %168 = tpu.matmul %166, %167, %cst_136 {dimension_numbers = #tpu.dot_dimension_numbers<[1], [0], [0], [1], [0, 0, 1, 1], [], []>} : vector<16x16xbf16>, vector<16x256xbf16>, vector<16x256xf32> -> vector<16x256xf32>
    %169 = arith.addf %159, %168 : vector<16x256xf32>
    %170 = vector.extract_strided_slice %138 {offsets = [0, 255], sizes = [16, 1], strides = [1, 1]} : vector<16x256xf32> to vector<16x1xf32>
    %171 = vector.extract_strided_slice %138 {offsets = [0, 0], sizes = [16, 255], strides = [1, 1]} : vector<16x256xf32> to vector<16x255xf32>
    %172 = tpu.concatenate %170, %171 in 1 : vector<16x1xf32>, vector<16x255xf32> -> vector<16x256xf32>
    %c3_137 = arith.constant 3 : index
    %c0_138 = arith.constant 0 : index
    %173 = vector.load %arg4[%c3_137, %c0_138] : memref<9x256xf32, #tpu.memory_space<vmem>>, vector<1x256xf32>
    %174 = vector.broadcast %173 : vector<1x256xf32> to vector<16x256xf32>
    %175 = arith.mulf %172, %174 : vector<16x256xf32>
    %c48_139 = arith.constant 48 : index
    %c0_140 = arith.constant 0 : index
    %176 = vector.load %arg5[%c48_139, %c0_140] : memref<144x16xbf16, #tpu.memory_space<vmem>>, vector<16x16xbf16>
    %177 = arith.truncf %175 : vector<16x256xf32> to vector<16x256xbf16>
    %cst_141 = arith.constant dense<0.000000e+00> : vector<16x256xf32>
    %178 = tpu.matmul %176, %177, %cst_141 {dimension_numbers = #tpu.dot_dimension_numbers<[1], [0], [0], [1], [0, 0, 1, 1], [], []>} : vector<16x16xbf16>, vector<16x256xbf16>, vector<16x256xf32> -> vector<16x256xf32>
    %179 = arith.addf %169, %178 : vector<16x256xf32>
    %c64_142 = arith.constant 64 : index
    %c0_143 = arith.constant 0 : index
    %180 = vector.load %arg5[%c64_142, %c0_143] : memref<144x16xbf16, #tpu.memory_space<vmem>>, vector<16x16xbf16>
    %181 = arith.truncf %138 : vector<16x256xf32> to vector<16x256xbf16>
    %cst_144 = arith.constant dense<0.000000e+00> : vector<16x256xf32>
    %182 = tpu.matmul %180, %181, %cst_144 {dimension_numbers = #tpu.dot_dimension_numbers<[1], [0], [0], [1], [0, 0, 1, 1], [], []>} : vector<16x16xbf16>, vector<16x256xbf16>, vector<16x256xf32> -> vector<16x256xf32>
    %183 = arith.addf %179, %182 : vector<16x256xf32>
    %184 = vector.extract_strided_slice %138 {offsets = [0, 1], sizes = [16, 255], strides = [1, 1]} : vector<16x256xf32> to vector<16x255xf32>
    %185 = vector.extract_strided_slice %138 {offsets = [0, 0], sizes = [16, 1], strides = [1, 1]} : vector<16x256xf32> to vector<16x1xf32>
    %186 = tpu.concatenate %184, %185 in 1 : vector<16x255xf32>, vector<16x1xf32> -> vector<16x256xf32>
    %c5_145 = arith.constant 5 : index
    %c0_146 = arith.constant 0 : index
    %187 = vector.load %arg4[%c5_145, %c0_146] : memref<9x256xf32, #tpu.memory_space<vmem>>, vector<1x256xf32>
    %188 = vector.broadcast %187 : vector<1x256xf32> to vector<16x256xf32>
    %189 = arith.mulf %186, %188 : vector<16x256xf32>
    %c80_147 = arith.constant 80 : index
    %c0_148 = arith.constant 0 : index
    %190 = vector.load %arg5[%c80_147, %c0_148] : memref<144x16xbf16, #tpu.memory_space<vmem>>, vector<16x16xbf16>
    %191 = arith.truncf %189 : vector<16x256xf32> to vector<16x256xbf16>
    %cst_149 = arith.constant dense<0.000000e+00> : vector<16x256xf32>
    %192 = tpu.matmul %190, %191, %cst_149 {dimension_numbers = #tpu.dot_dimension_numbers<[1], [0], [0], [1], [0, 0, 1, 1], [], []>} : vector<16x16xbf16>, vector<16x256xbf16>, vector<16x256xf32> -> vector<16x256xf32>
    %193 = arith.addf %183, %192 : vector<16x256xf32>
    %194 = vector.extract_strided_slice %138 {offsets = [0, 15], sizes = [16, 241], strides = [1, 1]} : vector<16x256xf32> to vector<16x241xf32>
    %195 = vector.extract_strided_slice %138 {offsets = [0, 0], sizes = [16, 15], strides = [1, 1]} : vector<16x256xf32> to vector<16x15xf32>
    %196 = tpu.concatenate %194, %195 in 1 : vector<16x241xf32>, vector<16x15xf32> -> vector<16x256xf32>
    %c6_150 = arith.constant 6 : index
    %c0_151 = arith.constant 0 : index
    %197 = vector.load %arg4[%c6_150, %c0_151] : memref<9x256xf32, #tpu.memory_space<vmem>>, vector<1x256xf32>
    %198 = vector.broadcast %197 : vector<1x256xf32> to vector<16x256xf32>
    %199 = arith.mulf %196, %198 : vector<16x256xf32>
    %c96_152 = arith.constant 96 : index
    %c0_153 = arith.constant 0 : index
    %200 = vector.load %arg5[%c96_152, %c0_153] : memref<144x16xbf16, #tpu.memory_space<vmem>>, vector<16x16xbf16>
    %201 = arith.truncf %199 : vector<16x256xf32> to vector<16x256xbf16>
    %cst_154 = arith.constant dense<0.000000e+00> : vector<16x256xf32>
    %202 = tpu.matmul %200, %201, %cst_154 {dimension_numbers = #tpu.dot_dimension_numbers<[1], [0], [0], [1], [0, 0, 1, 1], [], []>} : vector<16x16xbf16>, vector<16x256xbf16>, vector<16x256xf32> -> vector<16x256xf32>
    %203 = arith.addf %193, %202 : vector<16x256xf32>
    %204 = vector.extract_strided_slice %138 {offsets = [0, 16], sizes = [16, 240], strides = [1, 1]} : vector<16x256xf32> to vector<16x240xf32>
    %205 = vector.extract_strided_slice %138 {offsets = [0, 0], sizes = [16, 16], strides = [1, 1]} : vector<16x256xf32> to vector<16x16xf32>
    %206 = tpu.concatenate %204, %205 in 1 : vector<16x240xf32>, vector<16x16xf32> -> vector<16x256xf32>
    %c7_155 = arith.constant 7 : index
    %c0_156 = arith.constant 0 : index
    %207 = vector.load %arg4[%c7_155, %c0_156] : memref<9x256xf32, #tpu.memory_space<vmem>>, vector<1x256xf32>
    %208 = vector.broadcast %207 : vector<1x256xf32> to vector<16x256xf32>
    %209 = arith.mulf %206, %208 : vector<16x256xf32>
    %c112_157 = arith.constant 112 : index
    %c0_158 = arith.constant 0 : index
    %210 = vector.load %arg5[%c112_157, %c0_158] : memref<144x16xbf16, #tpu.memory_space<vmem>>, vector<16x16xbf16>
    %211 = arith.truncf %209 : vector<16x256xf32> to vector<16x256xbf16>
    %cst_159 = arith.constant dense<0.000000e+00> : vector<16x256xf32>
    %212 = tpu.matmul %210, %211, %cst_159 {dimension_numbers = #tpu.dot_dimension_numbers<[1], [0], [0], [1], [0, 0, 1, 1], [], []>} : vector<16x16xbf16>, vector<16x256xbf16>, vector<16x256xf32> -> vector<16x256xf32>
    %213 = arith.addf %203, %212 : vector<16x256xf32>
    %214 = vector.extract_strided_slice %138 {offsets = [0, 17], sizes = [16, 239], strides = [1, 1]} : vector<16x256xf32> to vector<16x239xf32>
    %215 = vector.extract_strided_slice %138 {offsets = [0, 0], sizes = [16, 17], strides = [1, 1]} : vector<16x256xf32> to vector<16x17xf32>
    %216 = tpu.concatenate %214, %215 in 1 : vector<16x239xf32>, vector<16x17xf32> -> vector<16x256xf32>
    %c8_160 = arith.constant 8 : index
    %c0_161 = arith.constant 0 : index
    %217 = vector.load %arg4[%c8_160, %c0_161] : memref<9x256xf32, #tpu.memory_space<vmem>>, vector<1x256xf32>
    %218 = vector.broadcast %217 : vector<1x256xf32> to vector<16x256xf32>
    %219 = arith.mulf %216, %218 : vector<16x256xf32>
    %c128_162 = arith.constant 128 : index
    %c0_163 = arith.constant 0 : index
    %220 = vector.load %arg5[%c128_162, %c0_163] : memref<144x16xbf16, #tpu.memory_space<vmem>>, vector<16x16xbf16>
    %221 = arith.truncf %219 : vector<16x256xf32> to vector<16x256xbf16>
    %cst_164 = arith.constant dense<0.000000e+00> : vector<16x256xf32>
    %222 = tpu.matmul %220, %221, %cst_164 {dimension_numbers = #tpu.dot_dimension_numbers<[1], [0], [0], [1], [0, 0, 1, 1], [], []>} : vector<16x16xbf16>, vector<16x256xbf16>, vector<16x256xf32> -> vector<16x256xf32>
    %223 = arith.addf %213, %222 : vector<16x256xf32>
    %c0_165 = arith.constant 0 : index
    %c0_166 = arith.constant 0 : index
    %224 = vector.load %arg6[%c0_165, %c0_166] : memref<16x1xf32, #tpu.memory_space<vmem>>, vector<16x1xf32>
    %225 = vector.broadcast %224 : vector<16x1xf32> to vector<16x256xf32>
    %226 = arith.addf %223, %225 : vector<16x256xf32>
    %cst_167 = arith.constant 0.000000e+00 : f32
    %227 = vector.broadcast %cst_167 : f32 to vector<16x256xf32>
    %228 = arith.maximumf %226, %227 : vector<16x256xf32>
    %cst_168 = arith.constant 0.000000e+00 : f32
    %229 = vector.broadcast %cst_168 : f32 to vector<16x256xf32>
    %230 = vector.extract_strided_slice %228 {offsets = [0, 239], sizes = [16, 17], strides = [1, 1]} : vector<16x256xf32> to vector<16x17xf32>
    %231 = vector.extract_strided_slice %228 {offsets = [0, 0], sizes = [16, 239], strides = [1, 1]} : vector<16x256xf32> to vector<16x239xf32>
    %232 = tpu.concatenate %230, %231 in 1 : vector<16x17xf32>, vector<16x239xf32> -> vector<16x256xf32>
    %c0_169 = arith.constant 0 : index
    %c0_170 = arith.constant 0 : index
    %233 = vector.load %arg4[%c0_169, %c0_170] : memref<9x256xf32, #tpu.memory_space<vmem>>, vector<1x256xf32>
    %234 = vector.broadcast %233 : vector<1x256xf32> to vector<16x256xf32>
    %235 = arith.mulf %232, %234 : vector<16x256xf32>
    %c0_171 = arith.constant 0 : index
    %c0_172 = arith.constant 0 : index
    %236 = vector.load %arg7[%c0_171, %c0_172] : memref<144x16xbf16, #tpu.memory_space<vmem>>, vector<16x16xbf16>
    %237 = arith.truncf %235 : vector<16x256xf32> to vector<16x256xbf16>
    %cst_173 = arith.constant dense<0.000000e+00> : vector<16x256xf32>
    %238 = tpu.matmul %236, %237, %cst_173 {dimension_numbers = #tpu.dot_dimension_numbers<[1], [0], [0], [1], [0, 0, 1, 1], [], []>} : vector<16x16xbf16>, vector<16x256xbf16>, vector<16x256xf32> -> vector<16x256xf32>
    %239 = arith.addf %229, %238 : vector<16x256xf32>
    %240 = vector.extract_strided_slice %228 {offsets = [0, 240], sizes = [16, 16], strides = [1, 1]} : vector<16x256xf32> to vector<16x16xf32>
    %241 = vector.extract_strided_slice %228 {offsets = [0, 0], sizes = [16, 240], strides = [1, 1]} : vector<16x256xf32> to vector<16x240xf32>
    %242 = tpu.concatenate %240, %241 in 1 : vector<16x16xf32>, vector<16x240xf32> -> vector<16x256xf32>
    %c1_174 = arith.constant 1 : index
    %c0_175 = arith.constant 0 : index
    %243 = vector.load %arg4[%c1_174, %c0_175] : memref<9x256xf32, #tpu.memory_space<vmem>>, vector<1x256xf32>
    %244 = vector.broadcast %243 : vector<1x256xf32> to vector<16x256xf32>
    %245 = arith.mulf %242, %244 : vector<16x256xf32>
    %c16_176 = arith.constant 16 : index
    %c0_177 = arith.constant 0 : index
    %246 = vector.load %arg7[%c16_176, %c0_177] : memref<144x16xbf16, #tpu.memory_space<vmem>>, vector<16x16xbf16>
    %247 = arith.truncf %245 : vector<16x256xf32> to vector<16x256xbf16>
    %cst_178 = arith.constant dense<0.000000e+00> : vector<16x256xf32>
    %248 = tpu.matmul %246, %247, %cst_178 {dimension_numbers = #tpu.dot_dimension_numbers<[1], [0], [0], [1], [0, 0, 1, 1], [], []>} : vector<16x16xbf16>, vector<16x256xbf16>, vector<16x256xf32> -> vector<16x256xf32>
    %249 = arith.addf %239, %248 : vector<16x256xf32>
    %250 = vector.extract_strided_slice %228 {offsets = [0, 241], sizes = [16, 15], strides = [1, 1]} : vector<16x256xf32> to vector<16x15xf32>
    %251 = vector.extract_strided_slice %228 {offsets = [0, 0], sizes = [16, 241], strides = [1, 1]} : vector<16x256xf32> to vector<16x241xf32>
    %252 = tpu.concatenate %250, %251 in 1 : vector<16x15xf32>, vector<16x241xf32> -> vector<16x256xf32>
    %c2_179 = arith.constant 2 : index
    %c0_180 = arith.constant 0 : index
    %253 = vector.load %arg4[%c2_179, %c0_180] : memref<9x256xf32, #tpu.memory_space<vmem>>, vector<1x256xf32>
    %254 = vector.broadcast %253 : vector<1x256xf32> to vector<16x256xf32>
    %255 = arith.mulf %252, %254 : vector<16x256xf32>
    %c32_181 = arith.constant 32 : index
    %c0_182 = arith.constant 0 : index
    %256 = vector.load %arg7[%c32_181, %c0_182] : memref<144x16xbf16, #tpu.memory_space<vmem>>, vector<16x16xbf16>
    %257 = arith.truncf %255 : vector<16x256xf32> to vector<16x256xbf16>
    %cst_183 = arith.constant dense<0.000000e+00> : vector<16x256xf32>
    %258 = tpu.matmul %256, %257, %cst_183 {dimension_numbers = #tpu.dot_dimension_numbers<[1], [0], [0], [1], [0, 0, 1, 1], [], []>} : vector<16x16xbf16>, vector<16x256xbf16>, vector<16x256xf32> -> vector<16x256xf32>
    %259 = arith.addf %249, %258 : vector<16x256xf32>
    %260 = vector.extract_strided_slice %228 {offsets = [0, 255], sizes = [16, 1], strides = [1, 1]} : vector<16x256xf32> to vector<16x1xf32>
    %261 = vector.extract_strided_slice %228 {offsets = [0, 0], sizes = [16, 255], strides = [1, 1]} : vector<16x256xf32> to vector<16x255xf32>
    %262 = tpu.concatenate %260, %261 in 1 : vector<16x1xf32>, vector<16x255xf32> -> vector<16x256xf32>
    %c3_184 = arith.constant 3 : index
    %c0_185 = arith.constant 0 : index
    %263 = vector.load %arg4[%c3_184, %c0_185] : memref<9x256xf32, #tpu.memory_space<vmem>>, vector<1x256xf32>
    %264 = vector.broadcast %263 : vector<1x256xf32> to vector<16x256xf32>
    %265 = arith.mulf %262, %264 : vector<16x256xf32>
    %c48_186 = arith.constant 48 : index
    %c0_187 = arith.constant 0 : index
    %266 = vector.load %arg7[%c48_186, %c0_187] : memref<144x16xbf16, #tpu.memory_space<vmem>>, vector<16x16xbf16>
    %267 = arith.truncf %265 : vector<16x256xf32> to vector<16x256xbf16>
    %cst_188 = arith.constant dense<0.000000e+00> : vector<16x256xf32>
    %268 = tpu.matmul %266, %267, %cst_188 {dimension_numbers = #tpu.dot_dimension_numbers<[1], [0], [0], [1], [0, 0, 1, 1], [], []>} : vector<16x16xbf16>, vector<16x256xbf16>, vector<16x256xf32> -> vector<16x256xf32>
    %269 = arith.addf %259, %268 : vector<16x256xf32>
    %c64_189 = arith.constant 64 : index
    %c0_190 = arith.constant 0 : index
    %270 = vector.load %arg7[%c64_189, %c0_190] : memref<144x16xbf16, #tpu.memory_space<vmem>>, vector<16x16xbf16>
    %271 = arith.truncf %228 : vector<16x256xf32> to vector<16x256xbf16>
    %cst_191 = arith.constant dense<0.000000e+00> : vector<16x256xf32>
    %272 = tpu.matmul %270, %271, %cst_191 {dimension_numbers = #tpu.dot_dimension_numbers<[1], [0], [0], [1], [0, 0, 1, 1], [], []>} : vector<16x16xbf16>, vector<16x256xbf16>, vector<16x256xf32> -> vector<16x256xf32>
    %273 = arith.addf %269, %272 : vector<16x256xf32>
    %274 = vector.extract_strided_slice %228 {offsets = [0, 1], sizes = [16, 255], strides = [1, 1]} : vector<16x256xf32> to vector<16x255xf32>
    %275 = vector.extract_strided_slice %228 {offsets = [0, 0], sizes = [16, 1], strides = [1, 1]} : vector<16x256xf32> to vector<16x1xf32>
    %276 = tpu.concatenate %274, %275 in 1 : vector<16x255xf32>, vector<16x1xf32> -> vector<16x256xf32>
    %c5_192 = arith.constant 5 : index
    %c0_193 = arith.constant 0 : index
    %277 = vector.load %arg4[%c5_192, %c0_193] : memref<9x256xf32, #tpu.memory_space<vmem>>, vector<1x256xf32>
    %278 = vector.broadcast %277 : vector<1x256xf32> to vector<16x256xf32>
    %279 = arith.mulf %276, %278 : vector<16x256xf32>
    %c80_194 = arith.constant 80 : index
    %c0_195 = arith.constant 0 : index
    %280 = vector.load %arg7[%c80_194, %c0_195] : memref<144x16xbf16, #tpu.memory_space<vmem>>, vector<16x16xbf16>
    %281 = arith.truncf %279 : vector<16x256xf32> to vector<16x256xbf16>
    %cst_196 = arith.constant dense<0.000000e+00> : vector<16x256xf32>
    %282 = tpu.matmul %280, %281, %cst_196 {dimension_numbers = #tpu.dot_dimension_numbers<[1], [0], [0], [1], [0, 0, 1, 1], [], []>} : vector<16x16xbf16>, vector<16x256xbf16>, vector<16x256xf32> -> vector<16x256xf32>
    %283 = arith.addf %273, %282 : vector<16x256xf32>
    %284 = vector.extract_strided_slice %228 {offsets = [0, 15], sizes = [16, 241], strides = [1, 1]} : vector<16x256xf32> to vector<16x241xf32>
    %285 = vector.extract_strided_slice %228 {offsets = [0, 0], sizes = [16, 15], strides = [1, 1]} : vector<16x256xf32> to vector<16x15xf32>
    %286 = tpu.concatenate %284, %285 in 1 : vector<16x241xf32>, vector<16x15xf32> -> vector<16x256xf32>
    %c6_197 = arith.constant 6 : index
    %c0_198 = arith.constant 0 : index
    %287 = vector.load %arg4[%c6_197, %c0_198] : memref<9x256xf32, #tpu.memory_space<vmem>>, vector<1x256xf32>
    %288 = vector.broadcast %287 : vector<1x256xf32> to vector<16x256xf32>
    %289 = arith.mulf %286, %288 : vector<16x256xf32>
    %c96_199 = arith.constant 96 : index
    %c0_200 = arith.constant 0 : index
    %290 = vector.load %arg7[%c96_199, %c0_200] : memref<144x16xbf16, #tpu.memory_space<vmem>>, vector<16x16xbf16>
    %291 = arith.truncf %289 : vector<16x256xf32> to vector<16x256xbf16>
    %cst_201 = arith.constant dense<0.000000e+00> : vector<16x256xf32>
    %292 = tpu.matmul %290, %291, %cst_201 {dimension_numbers = #tpu.dot_dimension_numbers<[1], [0], [0], [1], [0, 0, 1, 1], [], []>} : vector<16x16xbf16>, vector<16x256xbf16>, vector<16x256xf32> -> vector<16x256xf32>
    %293 = arith.addf %283, %292 : vector<16x256xf32>
    %294 = vector.extract_strided_slice %228 {offsets = [0, 16], sizes = [16, 240], strides = [1, 1]} : vector<16x256xf32> to vector<16x240xf32>
    %295 = vector.extract_strided_slice %228 {offsets = [0, 0], sizes = [16, 16], strides = [1, 1]} : vector<16x256xf32> to vector<16x16xf32>
    %296 = tpu.concatenate %294, %295 in 1 : vector<16x240xf32>, vector<16x16xf32> -> vector<16x256xf32>
    %c7_202 = arith.constant 7 : index
    %c0_203 = arith.constant 0 : index
    %297 = vector.load %arg4[%c7_202, %c0_203] : memref<9x256xf32, #tpu.memory_space<vmem>>, vector<1x256xf32>
    %298 = vector.broadcast %297 : vector<1x256xf32> to vector<16x256xf32>
    %299 = arith.mulf %296, %298 : vector<16x256xf32>
    %c112_204 = arith.constant 112 : index
    %c0_205 = arith.constant 0 : index
    %300 = vector.load %arg7[%c112_204, %c0_205] : memref<144x16xbf16, #tpu.memory_space<vmem>>, vector<16x16xbf16>
    %301 = arith.truncf %299 : vector<16x256xf32> to vector<16x256xbf16>
    %cst_206 = arith.constant dense<0.000000e+00> : vector<16x256xf32>
    %302 = tpu.matmul %300, %301, %cst_206 {dimension_numbers = #tpu.dot_dimension_numbers<[1], [0], [0], [1], [0, 0, 1, 1], [], []>} : vector<16x16xbf16>, vector<16x256xbf16>, vector<16x256xf32> -> vector<16x256xf32>
    %303 = arith.addf %293, %302 : vector<16x256xf32>
    %304 = vector.extract_strided_slice %228 {offsets = [0, 17], sizes = [16, 239], strides = [1, 1]} : vector<16x256xf32> to vector<16x239xf32>
    %305 = vector.extract_strided_slice %228 {offsets = [0, 0], sizes = [16, 17], strides = [1, 1]} : vector<16x256xf32> to vector<16x17xf32>
    %306 = tpu.concatenate %304, %305 in 1 : vector<16x239xf32>, vector<16x17xf32> -> vector<16x256xf32>
    %c8_207 = arith.constant 8 : index
    %c0_208 = arith.constant 0 : index
    %307 = vector.load %arg4[%c8_207, %c0_208] : memref<9x256xf32, #tpu.memory_space<vmem>>, vector<1x256xf32>
    %308 = vector.broadcast %307 : vector<1x256xf32> to vector<16x256xf32>
    %309 = arith.mulf %306, %308 : vector<16x256xf32>
    %c128_209 = arith.constant 128 : index
    %c0_210 = arith.constant 0 : index
    %310 = vector.load %arg7[%c128_209, %c0_210] : memref<144x16xbf16, #tpu.memory_space<vmem>>, vector<16x16xbf16>
    %311 = arith.truncf %309 : vector<16x256xf32> to vector<16x256xbf16>
    %cst_211 = arith.constant dense<0.000000e+00> : vector<16x256xf32>
    %312 = tpu.matmul %310, %311, %cst_211 {dimension_numbers = #tpu.dot_dimension_numbers<[1], [0], [0], [1], [0, 0, 1, 1], [], []>} : vector<16x16xbf16>, vector<16x256xbf16>, vector<16x256xf32> -> vector<16x256xf32>
    %313 = arith.addf %303, %312 : vector<16x256xf32>
    %c0_212 = arith.constant 0 : index
    %c0_213 = arith.constant 0 : index
    %314 = vector.load %arg8[%c0_212, %c0_213] : memref<16x1xf32, #tpu.memory_space<vmem>>, vector<16x1xf32>
    %315 = vector.broadcast %314 : vector<16x1xf32> to vector<16x256xf32>
    %316 = arith.addf %313, %315 : vector<16x256xf32>
    %cst_214 = arith.constant 0.000000e+00 : f32
    %317 = vector.broadcast %cst_214 : f32 to vector<16x256xf32>
    %318 = arith.maximumf %316, %317 : vector<16x256xf32>
    %c0_215 = arith.constant 0 : index
    %c0_216 = arith.constant 0 : index
    %c0_217 = arith.constant 0 : index
    %319 = vector.load %arg9[%c0_215, %c0_216, %c0_217] : memref<1x16x256xf32, #tpu.memory_space<vmem>>, vector<1x16x256xf32>
    %320 = vector.shape_cast %319 : vector<1x16x256xf32> to vector<16x256xf32>
    %321 = vector.shape_cast %318 : vector<16x256xf32> to vector<1x16x256xf32>
    tpu.vector_store %arg9[%c0_215, %c0_216, %c0_217], %321 {strides = array<i32>} : memref<1x16x256xf32, #tpu.memory_space<vmem>>, vector<1x16x256xf32>,
    return
  }
  func.func @transform_0(%arg0: i32) -> (i32, i32, i32) {
    %c0_i32 = arith.constant 0 : i32
    %c0_i32_0 = arith.constant 0 : i32
    %c0_i32_1 = arith.constant 0 : i32
    return %arg0, %c0_i32, %c0_i32_0 : i32, i32, i32
  }
  func.func @transform_1(%arg0: i32) -> (i32, i32, i32) {
    %c0_i32 = arith.constant 0 : i32
    %c0_i32_0 = arith.constant 0 : i32
    %c0_i32_1 = arith.constant 0 : i32
    return %arg0, %c0_i32, %c0_i32_0 : i32, i32, i32
  }
  func.func @transform_2(%arg0: i32) -> (i32, i32) {
    %c0_i32 = arith.constant 0 : i32
    %c0_i32_0 = arith.constant 0 : i32
    %c0_i32_1 = arith.constant 0 : i32
    return %c0_i32, %c0_i32_0 : i32, i32
  }
  func.func @transform_3(%arg0: i32) -> (i32, i32) {
    %c0_i32 = arith.constant 0 : i32
    %c0_i32_0 = arith.constant 0 : i32
    %c0_i32_1 = arith.constant 0 : i32
    return %c0_i32, %c0_i32_0 : i32, i32
  }
  func.func @transform_4(%arg0: i32) -> (i32, i32) {
    %c0_i32 = arith.constant 0 : i32
    %c0_i32_0 = arith.constant 0 : i32
    %c0_i32_1 = arith.constant 0 : i32
    return %c0_i32, %c0_i32_0 : i32, i32
  }
  func.func @transform_5(%arg0: i32) -> (i32, i32) {
    %c0_i32 = arith.constant 0 : i32
    %c0_i32_0 = arith.constant 0 : i32
    %c0_i32_1 = arith.constant 0 : i32
    return %c0_i32, %c0_i32_0 : i32, i32
  }
  func.func @transform_6(%arg0: i32) -> (i32, i32) {
    %c0_i32 = arith.constant 0 : i32
    %c0_i32_0 = arith.constant 0 : i32
    %c0_i32_1 = arith.constant 0 : i32
    return %c0_i32, %c0_i32_0 : i32, i32
  }
  func.func @transform_7(%arg0: i32) -> (i32, i32) {
    %c0_i32 = arith.constant 0 : i32
    %c0_i32_0 = arith.constant 0 : i32
    %c0_i32_1 = arith.constant 0 : i32
    return %c0_i32, %c0_i32_0 : i32, i32
  }
  func.func @transform_8(%arg0: i32) -> (i32, i32, i32) {
    %c0_i32 = arith.constant 0 : i32
    %c0_i32_0 = arith.constant 0 : i32
    %c0_i32_1 = arith.constant 0 : i32
    return %arg0, %c0_i32, %c0_i32_0 : i32, i32, i32
  }
}

</mosaic_0001>

<bundles_post_ra>
// kernel: up_forward.1
= control target key start
LH: loop header
LB: loop body
LE: loop exit
PB: predicated region body
PF: predicated region fallthrough
CT: control target
= control target key end

     0   :  { %13 = vsyncpa [#allocation5], 0  ;;  %s3101_s0 = inlined_call_operand.hbm [shape: f32[2,32,8], index: 0, kind: input, shape index: {}]   ;;  %s3102_s1 = inlined_call_operand.vmem [shape: f32[2,4,256], index: 1, kind: input, shape index: {}]   ;;  %s3103_s2 = inlined_call_operand.hbm [shape: f32[8,16], index: 2, kind: input, shape index: {}]   ;;  %s3104_s3 = inlined_call_operand.hbm [shape: f32[9,256], index: 3, kind: input, shape index: {}]   ;;  %s3105_s4 = inlined_call_operand.vmem [shape: bf16[144,16], index: 4, kind: input, shape index: {}]   ;;  %s3106_s5 = inlined_call_operand.hbm [shape: f32[16,1], index: 5, kind: input, shape index: {}]   ;;  %s3107_s6 = inlined_call_operand.vmem [shape: bf16[144,16], index: 6, kind: input, shape index: {}]   ;;  %s3108_s7 = inlined_call_operand.hbm [shape: f32[16,1], index: 7, kind: input, shape index: {}]   ;;  %s3109_s8 = inlined_call_operand.vmem [shape: f32[2,16,256], index: 8, kind: output, shape index: {}]  }
   0x1   :  { %15 = vsyncpa [#allocation5 + $0x1], 0 }
   0x2   :  { %16 = vsyncpa [#allocation7], 0 }
   0x3   :  { %17 = vsyncpa [#allocation10], 0  ;;  %s2543_s27 = smov 0   ;;  %s2545_s28 = smov 0  }
   0x4   :  { %s2547_s29 = smov 0   ;;  %s2549_s30 = smov 0  }
   0x5 LB: > { %s2562_s9 = sadd.s32 4294967295, %s2473_s30   ;;  %p43_p0 = scmp.ne.s32.totalorder %s2465_s28, %s2461_s27  ;;  %s2473_s30 = sphi %s2549_s30, %s3120_s30   ;;  %s2469_s29 = sphi %s2547_s29, %s3119_s29   ;;  %s2465_s28 = sphi %s2545_s28, %s3118_s28   ;;  %s2461_s27 = sphi %s2543_s27, %s3117_s27  }
   0x6   : > { %p44_p1 = scmp.eq.s32.totalorder %s2562_s9, 0  ;;  %p2025_p2 = scmp.ge.s32.totalorder %s2473_s30, 1 }
   0x7   : > { %p232_p3 = scmp.lt.s32.totalorder %s2473_s30, 3  ;;  %s244_s13 = sshll.u32 %s3103_s2, 4  ;;  %s245_s13 = int_to_ptr.hbm [resolvable:$true] %s244_s13 }
   0x8   : > { %p2570_p4 = por %p44_p1, %p43_p0  ;;  %s2475_s15 = smov [#allocation6]  }
   0x9   : > { %p2577_p5 = pnand %p2025_p2, %p232_p3  ;;  %s246_s16 = sshll.u32 %s2475_s15, 4  ;;  %s247_s16 = int_to_ptr.vmem [resolvable:$true] %s246_s16 }
   0xa   : > { %s272_s19 = sshll.u32 %s3106_s5, 4  ;;  %s2476_s21 = smov [#allocation9]   ;;  %s273_s19 = int_to_ptr.hbm [resolvable:$true] %s272_s19 }
   0xb   : > { %p2197_p6 = pneg %p2577_p5  ;;  %s274_s22 = sshll.u32 %s2476_s21, 4  ;;  %s275_s22 = int_to_ptr.vmem [resolvable:$true] %s274_s22 }
   0xc   : > { %s3110_s23 = smov 128   ;;  %s2478_s24 = smov 8  }
   0xd   : > { %p2588_p7 = pnand %p2197_p6, %p44_p1  ;;  %s255_s27 = sshll.u32 %s3104_s3, 4  ;;  %s256_s27 = int_to_ptr.hbm [resolvable:$true] %s255_s27 }
   0xe   : > { %s2479_s11 = smov [#allocation8]   ;;  %s2480_s17 = smov 256  }
   0xf   : > { %2200 = dma.hbm_to_vmem [thread:$0]  (!%p2588_p7), %s245_s13, 128, %s247_s16, [#allocation7]  }
  0x10   : > { %2206 = dma.hbm_to_vmem [thread:$0]  (!%p2588_p7), %s273_s19, 256, %s275_s22, [#allocation10], %s3110_s23, %s3110_s23, %s2478_s24  }
  0x11   : > { %s257_s12 = sshll.u32 %s2479_s11, 4  ;;  %s289_s16 = sshll.u32 %s3108_s7, 4  ;;  %s258_s12 = int_to_ptr.vmem [resolvable:$true] %s257_s12  ;;  %s290_s16 = int_to_ptr.hbm [resolvable:$true] %s289_s16 }
  0x12   : > { %s2481_s18 = smov 16   ;;  %s2482_s19 = smov [#allocation11]  }
  0x13   : > { %2203 = dma.hbm_to_vmem [thread:$0]  (!%p2588_p7), %s256_s27, 512, %s258_s12, [#allocation7], %s2480_s17, %s2480_s17, %s2481_s18  }
  0x14   : > { %s291_s21 = sshll.u32 %s2482_s19, 4  ;;  %s2613_s22 = sadd.s32 1, %s2473_s30   ;;  %s292_s21 = int_to_ptr.vmem [resolvable:$true] %s291_s21 }
  0x15   : > { %2209 = dma.hbm_to_vmem [thread:$0]  (!%p2588_p7), %s290_s16, 256, %s292_s21, [#allocation10], %s3110_s23, %s3110_s23, %s2478_s24  }
  0x16   : > { %s30_s25 = sadd.s32 1, %s2469_s29  ;;  %s27_s26 = ssub.s32 %s2473_s30, %s2613_s22 }
  0x17   : > { %p37_p8 = scmp.ne.s32.totalorder %s2469_s29, %s2465_s28  ;;  %p28_p9 = scmp.eq.s32.totalorder %s27_s26, 0 }
  0x18   : > { %p38_p10 = scmp.eq.s32.totalorder %s2473_s30, 0  ;;  %s305_s11 = sand.u32 1, %s2469_s29  }
  0x19   : > { %s2623_s27 = scalar_select %p28_p9, %s2469_s29, %s30_s25  }
  0x1a   : > { %p39_p11 = por %p38_p10, %p37_p8  ;;  %p2218_p12 = scmp.lt.s32.totalorder %s2473_s30, 2 }
  0x1b   : > { %s2031_s12 = sshll.u32 %s305_s11, 5  ;;  %s2158_s13 = sshll.u32 %s2473_s30, 5 }
  0x1c   : > { %s314_s17 = scalar_lea.hbm %s3101_s0, %s2158_s13  ;;  %s309_s18 = scalar_lea.vmem [#allocation4], %s2031_s12 }
  0x1d   : > { %s315_s16 = sshll.u32 %s314_s17, 4  ;;  %s317_s19 = sshll.u32 %s309_s18, 4  ;;  %s316_s16 = int_to_ptr.hbm [resolvable:$true] %s315_s16  ;;  %s318_s19 = int_to_ptr.vmem [resolvable:$true] %s317_s19 }
  0x1e   : > { %p2630_p13 = pnand %p2218_p12, %p39_p11  ;;  %s306_s25 = scalar_lea.sflag [#allocation5], %s305_s11 }
  0x1f   : > { %s2401_s26 = sshra.s32 %s316_s16, 4  ;;  %s2408_s12 = scalar_lea.hbm %s3101_s0, 64  ;;  %s2402_s26 = int_to_ptr.hbm [resolvable:$true] %s2401_s26 }
  0x20   : > { %s2403_s23 = scalar_lea.hbm %s2402_s26, 32  ;;  %p2405_p2 = pneg %p2630_p13 }
  0x21   : > { %p2404_p0 = scmp.ne.s32.totalorder %s2402_s26, %s2403_s23  ;;  %p2409_p7 = scmp.lt.s32.totalorder %s2402_s26, %s3101_s0 }
  0x22   : > { %p2410_p8 = scmp.lt.s32.totalorder %s2408_s12, %s2403_s23 }
  0x23   : > { %p2406_p3 = pnand %p2405_p2, %p2404_p0 }
  0x24   : > { %p2411_p9 = por %p2410_p8, %p2409_p7 }
  0x25   : > { %p2407_p6 = pneg %p2406_p3 }
  0x27   : > { %p2412_p10 = pnand %p2411_p9, %p2407_p6 }
  0x29   : > { %2415 = shalt.err (!%p2412_p10)
}
  0x2a   : > { %s3115_s11 = smov 128   ;;  %337 = sbr.rel (%p2577_p5) target bundleno = 1049 (0x419), region = 52 }
  0x2b   : > { %2213 = dma.hbm_to_vmem [thread:$0]  (!%p2630_p13), %s316_s16, 512, %s318_s19, %s306_s25, %s3115_s11, %s3115_s11, %s2478_s24  }
  0x2c   : > { %s339_s17 = sand.u32 (!%p2577_p5), 1, %s2465_s28  }
  0x2d   : > { %s2035_s18 = sshll.u32 (!%p2577_p5), %s339_s17, 5  ;;  %s340_s30 = scalar_lea.sflag (!%p2577_p5), [#allocation5], %s339_s17 }
  0x2e   : > { %s343_s13 = scalar_lea.vmem (!%p2577_p5), [#allocation4], %s2035_s18 }
  0x2f   : > { %2448 = dma.done.wait (%p2570_p4), %s340_s30, 512  }
  0x30   : > { %2450 = vsyncadd (%p2570_p4), %s340_s30, 4294966784 }
  0x31   : > { %2452 = dma.done.wait (%p44_p1), [#allocation7], 640  }
  0x32   : > { %2454 = vsyncadd (%p44_p1), [#allocation7], 4294966656 }
  0x33   : > { %2456 = dma.done.wait (%p44_p1), [#allocation10], 512  }
  0x34   : > { %2458 = vsyncadd (%p44_p1), [#allocation10], 4294966784  ;;  %vm418_vm0 = vcmask 64512   ;;  %v417_v0 = vld [vmem:[#allocation6] sm:$0xff]  ;;  %v414_v2 = vld [vmem:[%s343_s13 + $0x8] sm:$0xff]  ;;  %vm460_vm1 = vcmask 130048  }
  0x35   : > { %v413_v1 = vld [vmem:[%s343_s13] sm:$0xff]  ;;  %446 = vmatpush.msra.mxu0 %v417_v0  ;;  %v415_v3 = vld [vmem:[%s343_s13 + $0x10] sm:$0xff]  ;;  %v416_v4 = vld [vmem:[%s343_s13 + $0x18] sm:$0xff]  ;;  %s2483_s10 = smov 48   ;;  %s2484_s14 = smov 32   ;;  %vm473_vm2 = vcmask 130052  }
  0x36   : > { %2044 = vmatmul.msk.f32.vlgmr.msra.gmra.mxu0 %vm418_vm0, %v413_v1  ;;  %s2485_s23 = smov 16   ;;  %s2486_s24 = smov 80   ;;  %vm485_vm3 = vcmask 261252   ;;  %vm497_vm4 = vcmask 392452   ;;  %vm510_vm5 = vcmask 523652   ;;  %vm522_vm6 = vcmask 654852  }
  0x37   : > { %s2487_s16 = smov 64   ;;  %s2488_s19 = smov 96   ;;  %vm535_vm7 = vcmask 786052   ;;  %vm547_vm8 = vcmask 917252   ;;  %vm560_vm9 = vcmask 1048452   ;;  %vm679_vm10 = vcmask 138240  }
  0x38   : > { %s2489_s21 = smov 112   ;;  %p402_p1 = scmp.lt.s32.totalorder %s2562_s9, 1  ;;  %vm817_vm11 = vcmask 121856   ;;  %vm891_vm12 = vcmask 7168   ;;  %vm1081_vm13 = vcmask 924672   ;;  %vm1007_vm14 = vcmask 1039360  }
  0x39   : > { %s2491_s25 = smov 17   ;;  %s2492_s11 = smov 15   ;;  %vm1229_vm15 = vcmask 908288  }
  0x3a   : > { %s3122_s9 = smov (!%p402_p1, %s2562_s9), 1  ;;  %s2493_s17 = smov 1  }
  0x3b   : > { %s2159_s26 = sshll.u32 %s3122_s9, 3  ;;  %s2494_s18 = smov 127  }
  0x3c   : > { %s406_s15 = scalar_lea.vmem %s3102_s1, %s2159_s26  ;;  %s2495_s30 = smov 113  }
  0x3d   : > { %s2496_s13 = smov 111  }
  0x3e   : > { %2045 = vmatmul.msk.f32.gmra.mxu0 %vm418_vm0, %v414_v2 }
  0x46   : > { %2046 = vmatmul.msk.f32.gmra.mxu0 %vm418_vm0, %v415_v3 }
  0x4e   : > { %2047 = vmatmul.msk.f32.gmra.mxu0 %vm418_vm0, %v416_v4  ;;  %vm1155_vm0 = vcmask 916480  }
  0xb3   : > { %v448_v5 = vpop.f32.mrf.mxu0 }
  0xb4   : > { %461 = vst.msk [vmem:[#allocation2] sm:$0xff] %vm460_vm1, %v448_v5 }
  0xbb   : > { %v451_v6 = vpop.f32.mrf.mxu0 }
  0xbc   : > { %462 = vst.msk [vmem:[#allocation2 + $0x8] sm:$0xff] %vm460_vm1, %v451_v6 }
  0xc3   : > { %v454_v7 = vpop.f32.mrf.mxu0 }
  0xc4   : > { %463 = vst.msk [vmem:[#allocation2 + $0x10] sm:$0xff] %vm460_vm1, %v454_v7 }
  0xcb   : > { %v457_v8 = vpop.f32.mrf.mxu0 }
  0xcc   : > { %464 = vst.msk [vmem:[#allocation2 + $0x18] sm:$0xff] %vm460_vm1, %v457_v8 }
  0xd3   : > { %v499_v9 = vld [vmem:[#allocation2 + $0x1] ss:$8 sm:$0xf]  ;;  %v501_v10 = vld [vmem:[#allocation2 + $0x2] ss:$8 sm:$0xf] }
  0xd4   : > { %v502_v11 = vmul.f32 0.6, %v499_v9  ;;  %v503_v12 = vmul.f32 0.4, %v501_v10 }
  0xd5   : > { %v487_v13 = vld [vmem:[#allocation2] ss:$8 sm:$0xf]  ;;  %v488_v14 = vld [vmem:[#allocation2 + $0x1] ss:$8 sm:$0xf] }
  0xd6   : > { %v504_v15 = vadd.f32 %v503_v12, %v502_v11  ;;  %v489_v16 = vmul.f32 0.06666666, %v487_v13  ;;  %v490_v17 = vmul.f32 0.93333334, %v488_v14 }
  0xd7   : > { %v475_v18 = vld [vmem:[#allocation2] ss:$8 sm:$0xf]  ;;  %v476_v19 = vld [vmem:[#allocation2 + $0x1] ss:$8 sm:$0xf] }
  0xd8   : > { %v506_v20 = vrot.slane %v504_v15, 4  ;;  %v491_v21 = vadd.f32 %v490_v17, %v489_v16  ;;  %v477_v22 = vmul.f32 0.5333333, %v475_v18  ;;  %v478_v23 = vmul.f32 0.46666667, %v476_v19 }
  0xd9   : > { %v594_v24 = vld [vmem:[#allocation2 + $0x5] ss:$8 sm:$0xf]  ;;  %v596_v25 = vld [vmem:[#allocation2 + $0x6] ss:$8 sm:$0xf] }
  0xda   : > { %507 = vrot.lane.b32.xlu2 %v506_v20, %s2483_s10  ;;  %v493_v26 = vrot.slane %v491_v21, 4  ;;  %v479_v27 = vadd.f32 %v478_v23, %v477_v22  ;;  %v597_v28 = vmul.f32 0.8666667, %v594_v24  ;;  %v598_v29 = vmul.f32 0.13333334, %v596_v25 }
  0xdb   : > { %v583_v30 = vld [vmem:[#allocation2 + $0x4] ss:$8 sm:$0xf]  ;;  %v584_v31 = vld [vmem:[#allocation2 + $0x5] ss:$8 sm:$0xf] }
  0xdc   : > { %494 = vrot.lane.b32.xlu1 %v493_v26, %s2484_s14  ;;  %v481_v32 = vrot.slane %v479_v27, 4  ;;  %v599_v33 = vadd.f32 %v598_v29, %v597_v28  ;;  %v585_v34 = vmul.f32 0.3333333, %v583_v30  ;;  %v586_v35 = vmul.f32 0.6666667, %v584_v31 }
  0xdd   : > { %v571_v36 = vld [vmem:[#allocation2 + $0x4] ss:$8 sm:$0xf]  ;;  %v573_v37 = vld [vmem:[#allocation2 + $0x5] ss:$8 sm:$0xf] }
  0xde   : > { %482 = vrot.lane.b32.xlu0 %v481_v32, %s2485_s23  ;;  %v587_v38 = vadd.f32 %v586_v35, %v585_v34  ;;  %v574_v39 = vmul.f32 0.8, %v571_v36  ;;  %v575_v40 = vmul.f32 0.2, %v573_v37  ;;  %v601_v43 = vrot.slane %v599_v33, 4 }
  0xdf   : > { %v524_v41 = vld [vmem:[#allocation2 + $0x2] ss:$8 sm:$0xf]  ;;  %v526_v42 = vld [vmem:[#allocation2 + $0x3] ss:$8 sm:$0xf] }
  0xe0   : > { %v576_v44 = vadd.f32 %v575_v40, %v574_v39  ;;  %v527_v45 = vmul.f32 0.6666666, %v524_v41  ;;  %v528_v46 = vmul.f32 0.33333334, %v526_v42  ;;  %v589_v49 = vrot.slane %v587_v38, 4 }
  0xe1   : > { %v606_v47 = vld [vmem:[#allocation2 + $0x5] ss:$8 sm:$0xf]  ;;  %v607_v48 = vld [vmem:[#allocation2 + $0x6] ss:$8 sm:$0xf] }
  0xe2   : > { %602 = vrot.lane.b32.xlu2 %v601_v43, %s2483_s10  ;;  %v608_v50 = vmul.f32 0.39999998, %v606_v47  ;;  %v609_v51 = vmul.f32 0.6, %v607_v48  ;;  %v578_v54 = vrot.slane %v576_v44, 4  ;;  %v529_v55 = vadd.f32 %v528_v46, %v527_v45  ;;  %v650_v43 = vld [vmem:[%s406_s15] sm:$0xff] }
  0xe3   : > { %v512_v52 = vld [vmem:[#allocation2 + $0x1] ss:$8 sm:$0xf]  ;;  %v513_v53 = vld [vmem:[#allocation2 + $0x2] ss:$8 sm:$0xf] }
  0xe4   : > { %590 = vrot.lane.b32.xlu1 %v589_v49, %s2484_s14  ;;  %v514_v56 = vmul.f32 0.13333333, %v512_v52  ;;  %v515_v57 = vmul.f32 0.8666667, %v513_v53  ;;  %v610_v60 = vadd.f32 %v609_v51, %v608_v50  ;;  %v531_v63 = vrot.slane %v529_v55, 4 }
  0xe5   : > { %v629_v58 = vld [vmem:[#allocation2 + $0x6] ss:$8 sm:$0xf]  ;;  %v630_v59 = vld [vmem:[#allocation2 + $0x7] ss:$8 sm:$0xf] }
  0xe6   : > { %579 = vrot.lane.b32.xlu0 %v578_v54, %s2485_s23  ;;  %v537_v61 = vld [vmem:[#allocation2 + $0x2] ss:$8 sm:$0xf]  ;;  %v538_v62 = vld [vmem:[#allocation2 + $0x3] ss:$8 sm:$0xf]  ;;  %v516_v0 = vadd.f32 %v515_v57, %v514_v56 }
  0xe7   : > { %v631_v1 = vmul.f32 0.46666664, %v629_v58  ;;  %v632_v2 = vmul.f32 0.53333336, %v630_v59  ;;  %v612_v5 = vrot.slane %v610_v60, 4  ;;  %v2490_v40 = vmov 0.0  }
  0xe8   : > { %v617_v3 = vld [vmem:[#allocation2 + $0x6] ss:$8 sm:$0xf]  ;;  %v619_v4 = vld [vmem:[#allocation2 + $0x7] ss:$8 sm:$0xf] }
  0xe9   : > { %v539_v6 = vmul.f32 0.19999999, %v537_v61  ;;  %v540_v7 = vmul.f32 0.8, %v538_v62  ;;  %v518_v8 = vrot.slane %v516_v0, 4  ;;  %v633_v9 = vadd.f32 %v632_v2, %v631_v1 }
  0xea   : > { %532 = vrot.lane.b32.xlu2 %v531_v63, %s2486_s24  ;;  %v620_v10 = vmul.f32 0.93333334, %v617_v3  ;;  %v621_v11 = vmul.f32 0.06666667, %v619_v4  ;;  %652 = vst [vmem:[#allocation1] ss:$2 sm:$0xff] %v650_v43 }
  0xeb   : > { %v541_v12 = vadd.f32 %v540_v7, %v539_v6  ;;  %v640_v13 = vld [vmem:[#allocation2 + $0x6] ss:$8 sm:$0xf]  ;;  %v549_v14 = vld [vmem:[#allocation2 + $0x3] ss:$8 sm:$0xf] }
  0xec   : > { %613 = vrot.lane.b32.xlu1 %v612_v5, %s2487_s16  ;;  %v551_v15 = vld [vmem:[#allocation2 + $0x4] ss:$8 sm:$0xf]  ;;  %v465_v16 = vld [vmem:[#allocation2] ss:$8 sm:$0xf]  ;;  %v622_v20 = vadd.f32 %v621_v11, %v620_v10 }
  0xed   : > { %v467_v17 = vld [vmem:[#allocation2 + $0x1] ss:$8 sm:$0xf]  ;;  %v562_v18 = vld [vmem:[#allocation2 + $0x3] ss:$8 sm:$0xf] }
  0xee   : > { %519 = vrot.lane.b32.xlu0 %v518_v8, %s2487_s16  ;;  %v635_v19 = vrot.slane %v633_v9, 4  ;;  %v468_v21 = vmul.f32 0.0, %v467_v17  ;;  %v563_v22 = vld [vmem:[#allocation2 + $0x4] ss:$8 sm:$0xf]  ;;  %v543_v25 = vrot.slane %v541_v12, 4 }
  0xef   : > { %v564_v23 = vmul.f32 0.26666665, %v562_v18  ;;  %v565_v24 = vmul.f32 0.73333335, %v563_v22  ;;  %v642_v26 = vmul.f32 0.0, %v640_v13  ;;  %v624_v29 = vrot.slane %v622_v20, 4 }
  0xf0   : > { %v469_v27 = vadd.f32 %v468_v21, %v465_v16  ;;  %v552_v30 = vmul.f32 0.73333335, %v549_v14  ;;  %v553_v31 = vmul.f32 0.26666668, %v551_v15  ;;  %v2161_v18 = vld [vmem:[%s3105_s4] sm:$0xff] }
  0xf1   : > { %v566_v28 = vadd.f32 %v565_v24, %v564_v23  ;;  %v641_v33 = vld [vmem:[#allocation2 + $0x7] ss:$8 sm:$0xf]  ;;  %v688_v1 = vld [vmem:[#allocation8] ss:$8 sm:$0x3] }
  0xf2   : > { %636 = vrot.lane.b32.xlu2 %v635_v19, %s2488_s19  ;;  %v471_v32 = vrot.slane %v469_v27, 4  ;;  %v643_v35 = vadd.f32 %v642_v26, %v641_v33  ;;  %v554_v36 = vadd.f32 %v553_v31, %v552_v30  ;;  %v654_v47 = vld.sshfl [vmem:[#allocation1 + $0x8] sm:$0xff pattern:$0x75316420]  ;;  %v2748_v3 = vperm.slane %v688_v1, 0 }
  0xf3   : > { %v568_v34 = vrot.slane %v566_v28, 4  ;;  %658 = vst [vmem:[#allocation3 + $0x8] sm:$0xf] %v654_v47  ;;  %v653_v48 = vld.sshfl [vmem:[#allocation1] sm:$0xff pattern:$0x75316420] }
  0xf4   : > { %544 = vrot.lane.b32.xlu1 %v543_v25, %s2488_s19  ;;  %474 = vst.msk [vmem:[#allocation3] sm:$0xf0] %vm473_vm2, %v471_v32  ;;  %v645_v37 = vrot.slane %v643_v35, 4  ;;  %v556_v38 = vrot.slane %v554_v36, 4  ;;  %v2761_v15 = vperm.slane %v688_v1, 1 }
  0xf5   : > { %570 = vst.msk [vmem:[#allocation3 + $0x8] sm:$0xf0] %vm473_vm2, %v568_v34  ;;  %v721_v7 = vld [vmem:[#allocation8 + $0x1] ss:$8 sm:$0x3]  ;;  %v2162_v34 = vld [vmem:[%s3105_s4 + $0x8] sm:$0xff] }
  0xf6   : > { %625 = vrot.lane.b32.xlu0 %v624_v29, %s2486_s24  ;;  %657 = vst [vmem:[#allocation3] sm:$0xf] %v653_v48  ;;  %v2757_v13 = vperm.slane %v721_v7, 0  ;;  %v2759_v14 = vperm.slane %v721_v7, 1 }
  0xf7   : > { %v827_v30 = vld [vmem:[#allocation8 + $0x2] ss:$8 sm:$0x3] }
  0xf8   : > { %v2781_v35 = vperm.slane %v827_v30, 0  ;;  %v2783_v36 = vperm.slane %v827_v30, 1 }
  0xfa   : > { %677 = vrot.lane.b32.xlu2 %v2490_v40, %s2491_s25 }
  0xfc   : > { %646 = vrot.lane.b32.xlu1 %v645_v37, %s2489_s21 }
  0xfe   : > { %557 = vrot.lane.b32.xlu0 %v556_v38, %s2489_s21 }
 0x104   : > { %704 = vrot.lane.b32.xlu1 %v2490_v40, %s2485_s23 }
 0x106   : > { %669 = vrot.lane.b32.xlu0 %v2490_v40, %s2491_s25 }
 0x134   : > { %v508_v39 = vpop.permute.xlu2 %507 }
 0x13c   : > { %v603_v44 = vpop.permute.xlu2 %602 }
 0x144   : > { %v533_v50 = vpop.permute.xlu2 %532 }
 0x14c   : > { %v637_v54 = vpop.permute.xlu2 %636 }
 0x14e   : > { %v495_v41 = vpop.permute.xlu1 %494 }
 0x150   : > { %v483_v42 = vpop.permute.xlu0 %482 }
 0x151   : > { %486 = vst.msk [vmem:[#allocation3] sm:$0xf0] %vm485_vm3, %v483_v42 }
 0x152   : > { %498 = vst.msk [vmem:[#allocation3] sm:$0xf0] %vm497_vm4, %v495_v41 }
 0x153   : > { %511 = vst.msk [vmem:[#allocation3] sm:$0xf0] %vm510_vm5, %v508_v39 }
 0x154   : > { %v678_v59 = vpop.permute.xlu2 %677 }
 0x156   : > { %v591_v45 = vpop.permute.xlu1 %590 }
 0x158   : > { %v580_v46 = vpop.permute.xlu0 %579 }
 0x159   : > { %582 = vst.msk [vmem:[#allocation3 + $0x8] sm:$0xf0] %vm485_vm3, %v580_v46 }
 0x15a   : > { %593 = vst.msk [vmem:[#allocation3 + $0x8] sm:$0xf0] %vm497_vm4, %v591_v45 }
 0x15b   : > { %605 = vst.msk [vmem:[#allocation3 + $0x8] sm:$0xf0] %vm510_vm5, %v603_v44 }
 0x15e   : > { %v614_v49 = vpop.permute.xlu1 %613 }
 0x15f   : > { %616 = vst.msk [vmem:[#allocation3 + $0x8] sm:$0xf0] %vm522_vm6, %v614_v49 }
 0x160   : > { %v520_v51 = vpop.permute.xlu0 %519 }
 0x161   : > { %523 = vst.msk [vmem:[#allocation3] sm:$0xf0] %vm522_vm6, %v520_v51 }
 0x162   : > { %536 = vst.msk [vmem:[#allocation3] sm:$0xf0] %vm535_vm7, %v533_v50 }
 0x166   : > { %v545_v52 = vpop.permute.xlu1 %544 }
 0x167   : > { %548 = vst.msk [vmem:[#allocation3] sm:$0xf0] %vm547_vm8, %v545_v52  ;;  %v2163_v52 = vld [vmem:[%s3105_s4 + $0x10] sm:$0xff] }
 0x168   : > { %v626_v53 = vpop.permute.xlu0 %625 }
 0x169   : > { %628 = vst.msk [vmem:[#allocation3 + $0x8] sm:$0xf0] %vm535_vm7, %v626_v53 }
 0x16a   : > { %639 = vst.msk [vmem:[#allocation3 + $0x8] sm:$0xf0] %vm547_vm8, %v637_v54 }
 0x16e   : > { %v647_v55 = vpop.permute.xlu1 %646 }
 0x16f   : > { %649 = vst.msk [vmem:[#allocation3 + $0x8] sm:$0xf0] %vm560_vm9, %v647_v55 }
 0x170   : > { %v558_v56 = vpop.permute.xlu0 %557 }
 0x171   : > { %561 = vst.msk [vmem:[#allocation3] sm:$0xf0] %vm560_vm9, %v558_v56  ;;  %v901_v56 = vld [vmem:[#allocation8 + $0x3] ss:$8 sm:$0x3] }
 0x176   : > { %v2686_v57 = vld [vmem:[#allocation3 + $0x8] sm:$0xff]  ;;  %v705_v63 = vpop.permute.xlu1 %704 }
 0x177   : > { %702 = vrot.lane.b32.xlu0 %v2686_v57, %s2485_s23  ;;  %667 = vrot.lane.b32.xlu2 %v2686_v57, %s2491_s25  ;;  %v958_v51 = vpack.c.bf16 0.0, %v2686_v57 }
 0x178   : > { %v2692_v58 = vld [vmem:[#allocation3] sm:$0xff]  ;;  %v670_v62 = vpop.permute.xlu0 %669 }
 0x179   : > { %675 = vrot.lane.b32.xlu1 %v2692_v58, %s2491_s25  ;;  %v687_v4 = vsel %vm679_vm10, %v670_v62, %v678_v59  ;;  %v681_v19 = vsel %vm679_vm10, %v678_v59, %v670_v62  ;;  %v957_v50 = vpack.c.bf16 0.0, %v2692_v58  ;;  %v2801_v59 = vperm.slane %v901_v56, 0 }
 0x17a   : > { %v696_v9 = vmul.f32 %v2748_v3, %v687_v4  ;;  %v697_v29 = vmul.f32 %v2761_v15, %v681_v19 }
 0x17f   : > { %710 = vrot.lane.b32.xlu0 %v2490_v40, %s2485_s23  ;;  %708 = vrot.lane.b32.xlu2 %v2692_v58, %s2485_s23 }
 0x181   : > { %807 = vrot.lane.b32.xlu1 %v2686_v57, %s2492_s11 }
 0x187   : > { %813 = vrot.lane.b32.xlu0 %v2692_v58, %s2492_s11  ;;  %809 = vrot.lane.b32.xlu2 %v2490_v40, %s2492_s11 }
 0x189   : > { %815 = vrot.lane.b32.xlu1 %v2490_v40, %s2492_s11 }
 0x18f   : > { %883 = vrot.lane.b32.xlu0 %v2490_v40, %s2493_s17  ;;  %889 = vrot.lane.b32.xlu2 %v2490_v40, %s2493_s17 }
 0x191   : > { %1005 = vrot.lane.b32.xlu1 %v2490_v40, %s2494_s18 }
 0x197   : > { %1079 = vrot.lane.b32.xlu0 %v2490_v40, %s2495_s30  ;;  %1077 = vrot.lane.b32.xlu2 %v2490_v40, %s2495_s30 }
 0x199   : > { %887 = vrot.lane.b32.xlu1 %v2692_v58, %s2493_s17 }
 0x19f   : > { %1003 = vrot.lane.b32.xlu0 %v2490_v40, %s2494_s18  ;;  %881 = vrot.lane.b32.xlu2 %v2686_v57, %s2493_s17 }
 0x1a1   : > { %1075 = vrot.lane.b32.xlu1 %v2686_v57, %s2495_s30 }
 0x1a7   : > { %1073 = vrot.lane.b32.xlu0 %v2692_v58, %s2495_s30  ;;  %1227 = vrot.lane.b32.xlu2 %v2490_v40, %s2496_s13 }
 0x1a9   : > { %999 = vrot.lane.b32.xlu1 %v2692_v58, %s2494_s18 }
 0x1af   : > { %1223 = vrot.lane.b32.xlu0 %v2686_v57, %s2496_s13  ;;  %1001 = vrot.lane.b32.xlu2 %v2686_v57, %s2494_s18 }
 0x1b1   : > { %1225 = vrot.lane.b32.xlu1 %v2490_v40, %s2496_s13 }
 0x1b7   : > { %1147 = vrot.lane.b32.xlu0 %v2692_v58, %s2489_s21  ;;  %1221 = vrot.lane.b32.xlu2 %v2692_v58, %s2496_s13  ;;  %v2803_v58 = vperm.slane %v901_v56, 1 }
 0x1b9   : > { %1149 = vrot.lane.b32.xlu1 %v2686_v57, %s2489_s21 }
 0x1bf   : > { %1153 = vrot.lane.b32.xlu0 %v2490_v40, %s2489_s21  ;;  %1151 = vrot.lane.b32.xlu2 %v2490_v40, %s2489_s21 }
 0x1d1   : > { %v668_v60 = vpop.permute.xlu2 %667 }
 0x1d9   : > { %v709_v61 = vpop.permute.xlu2 %708 }
 0x1e1   : > { %v810_v0 = vpop.permute.xlu2 %809 }
 0x1e9   : > { %v703_v2 = vpop.permute.xlu0 %702  ;;  %v2754_v10 = vpop.permute.xlu2 %889 }
 0x1ea   : > { %v712_v16 = vsel %vm460_vm1, %v709_v61, %v703_v2  ;;  %v718_v17 = vsel %vm460_vm1, %v703_v2, %v709_v61 }
 0x1eb   : > { %v676_v5 = vpop.permute.xlu1 %675  ;;  %v727_v25 = vmul.f32 %v2757_v13, %v718_v17  ;;  %v728_v27 = vmul.f32 %v2759_v14, %v712_v16  ;;  %v1019_v17 = vld [vmem:[#allocation8 + $0x5] ss:$8 sm:$0x3] }
 0x1ec   : > { %v686_v6 = vsel %vm679_vm10, %v668_v60, %v676_v5  ;;  %v680_v11 = vsel %vm679_vm10, %v676_v5, %v668_v60 }
 0x1ed   : > { %v694_v8 = vmul.f32 %v2748_v3, %v686_v6  ;;  %v695_v21 = vmul.f32 %v2761_v15, %v680_v11 }
 0x1ef   : > { %v700_v12 = vpack.c.bf16 %v696_v9, %v694_v8  ;;  %v701_v33 = vpack.c.bf16 %v697_v29, %v695_v21  ;;  %v2164_v9 = vld [vmem:[%s3105_s4 + $0x18] sm:$0xff] }
 0x1f1   : > { %786 = vmatpush.bf16.msra.mxu3 %v700_v12  ;;  %v711_v20 = vpop.permute.xlu0 %710  ;;  %v1078_v37 = vpop.permute.xlu2 %1077  ;;  %v1093_v12 = vld [vmem:[#allocation8 + $0x6] ss:$8 sm:$0x3] }
 0x1f2   : > { %v713_v22 = vsel %vm460_vm1, %v711_v20, %v705_v63  ;;  %v719_v23 = vsel %vm460_vm1, %v705_v63, %v711_v20  ;;  %v2829_v19 = vperm.slane %v1093_v12, 1 }
 0x1f3   : > { %v808_v24 = vpop.permute.xlu1 %807  ;;  %v729_v26 = vmul.f32 %v2757_v13, %v719_v23  ;;  %v730_v28 = vmul.f32 %v2759_v14, %v713_v22  ;;  %v2833_v23 = vperm.slane %v1019_v17, 0 }
 0x1f4   : > { %2058 = vmatmul.msk.bf16.vlgmr.msra.gmra.mxu3 %vm460_vm1, %v2161_v18 }
 0x1f5   : > { %v733_v31 = vpack.c.bf16 %v729_v26, %v727_v25  ;;  %v734_v32 = vpack.c.bf16 %v730_v28, %v728_v27 }
 0x1f7   : > { %750 = vmatpush.bf16.msra.mxu1 %v733_v31  ;;  %764 = vmatpush.bf16.msra.mxu2 %v734_v32 }
 0x1f9   : > { %v814_v38 = vpop.permute.xlu0 %813  ;;  %v882_v54 = vpop.permute.xlu2 %881 }
 0x1fa   : > { %v818_v39 = vsel %vm817_vm11, %v814_v38, %v808_v24  ;;  %v824_v40 = vsel %vm817_vm11, %v808_v24, %v814_v38  ;;  %2052 = vmatmul.msk.bf16.vlgmr.msra.gmra.mxu1 %vm460_vm1, %v2162_v34  ;;  %2053 = vmatmul.msk.bf16.vlgmr.msra.gmra.mxu2 %vm460_vm1, %v2162_v34  ;;  %v2835_v24 = vperm.slane %v1019_v17, 1  ;;  %v1295_v38 = vld [vmem:[#allocation9] sm:$0xff] }
 0x1fb   : > { %800 = vmatpush.bf16.msrb.mxu1 %v701_v33  ;;  %v833_v41 = vmul.f32 %v2781_v35, %v824_v40  ;;  %v834_v42 = vmul.f32 %v2783_v36, %v818_v39  ;;  %v816_v43 = vpop.permute.xlu1 %815  ;;  %v1296_v39 = vld [vmem:[#allocation9 + $0x8] sm:$0xff] }
 0x1fc   : > { %v819_v44 = vsel %vm817_vm11, %v816_v43, %v810_v0  ;;  %v825_v45 = vsel %vm817_vm11, %v810_v0, %v816_v43  ;;  %v1241_v43 = vld [vmem:[#allocation8 + $0x10] ss:$8 sm:$0x3] }
 0x1fd   : > { %v835_v46 = vmul.f32 %v2781_v35, %v825_v45  ;;  %v836_v47 = vmul.f32 %v2783_v36, %v819_v44  ;;  %v2497_v44 = vmov 0  }
 0x1fe   : > { %2278 = vset.pattern.permute.xlu1 %v2497_v44  ;;  %2279 = vset.pattern.permute.xlu2 %v2497_v44 }
 0x1ff   : > { %v839_v48 = vpack.c.bf16 %v835_v46, %v833_v41  ;;  %v840_v49 = vpack.c.bf16 %v836_v47, %v834_v42  ;;  %1299 = vperm.xlu1 %2278, %v1295_v38   ;;  %1304 = vperm.xlu2 %2279, %v1296_v39  }
 0x200   : > { %2280 = vset.pattern.permute.xlu0 %v2497_v44 }
 0x201   : > { %856 = vmatpush.bf16.msrb.mxu2 %v839_v48  ;;  %870 = vmatpush.bf16.msrb.mxu3 %v840_v49  ;;  %v884_v53 = vpop.permute.xlu0 %883  ;;  %v2815_v4 = vpop.permute.xlu2 %1227 }
 0x202   : > { %v893_v60 = vsel %vm891_vm12, %v2754_v10, %v884_v53  ;;  %v899_v61 = vsel %vm891_vm12, %v884_v53, %v2754_v10  ;;  %v2165_v10 = vld [vmem:[%s3105_s4 + $0x20] sm:$0xff]  ;;  %v2166_v53 = vld [vmem:[%s3105_s4 + $0x28] sm:$0xff] }
 0x203   : > { %v1006_v55 = vpop.permute.xlu1 %1005  ;;  %v909_v1 = vmul.f32 %v2801_v59, %v899_v61  ;;  %v910_v2 = vmul.f32 %v2803_v58, %v893_v60 }
 0x204   : > { %2065 = vmatmul.msk.bf16.vlgmr.msrb.gmra.mxu3 %vm460_vm1, %v2163_v52 }
 0x205   : > { %974 = vmatpush.bf16.msra.mxu2 %v957_v50  ;;  %988 = vmatpush.bf16.msra.mxu3 %v958_v51  ;;  %v2853_v51 = vperm.slane %v1241_v43, 0 }
 0x209   : > { %v1080_v57 = vpop.permute.xlu0 %1079  ;;  %v1002_v22 = vpop.permute.xlu2 %1001 }
 0x20a   : > { %2059 = vmatmul.msk.bf16.vlgmr.msrb.gmra.mxu1 %vm460_vm1, %v2161_v18  ;;  %2064 = vmatmul.msk.bf16.vlgmr.msrb.gmra.mxu2 %vm460_vm1, %v2163_v52  ;;  %v2827_v18 = vperm.slane %v1093_v12, 0  ;;  %v1083_v20 = vsel %vm1081_vm13, %v1078_v37, %v1080_v57  ;;  %v1091_v21 = vsel %vm1081_vm13, %v1080_v57, %v1078_v37  ;;  %v2855_v52 = vperm.slane %v1241_v43, 1 }
 0x20b   : > { %v888_v62 = vpop.permute.xlu1 %887  ;;  %v1102_v29 = vmul.f32 %v2829_v19, %v1091_v21 }
 0x20c   : > { %v892_v63 = vsel %vm891_vm12, %v888_v62, %v882_v54  ;;  %v898_v0 = vsel %vm891_vm12, %v882_v54, %v888_v62  ;;  %v1101_v26 = vmul.f32 %v2827_v18, %v1083_v20  ;;  %v2167_v54 = vld [vmem:[%s3105_s4 + $0x30] sm:$0xff]  ;;  %v2169_v20 = vld [vmem:[%s3105_s4 + $0x40] sm:$0xff] }
 0x20d   : > { %v907_v5 = vmul.f32 %v2801_v59, %v898_v0  ;;  %v908_v6 = vmul.f32 %v2803_v58, %v892_v63 }
 0x20f   : > { %v914_v7 = vpack.c.bf16 %v910_v2, %v908_v6  ;;  %v913_v8 = vpack.c.bf16 %v909_v1, %v907_v5 }
 0x211   : > { %930 = vmatpush.bf16.msrb.mxu0 %v913_v8  ;;  %944 = vmatpush.bf16.msra.mxu1 %v914_v7  ;;  %v1004_v11 = vpop.permute.xlu0 %1003 }
 0x212   : > { %v1009_v25 = vsel %vm1007_vm14, %v1004_v11, %v1006_v55  ;;  %v1017_v27 = vsel %vm1007_vm14, %v1006_v55, %v1004_v11  ;;  %v1222_v55 = vpop.permute.xlu2 %1221 }
 0x213   : > { %v1076_v16 = vpop.permute.xlu1 %1075  ;;  %v1027_v32 = vmul.f32 %v2833_v23, %v1009_v25  ;;  %v1028_v40 = vmul.f32 %v2835_v24, %v1017_v27 }
 0x214   : > { %2070 = vmatmul.msk.bf16.vlgmr.msrb.gmra.mxu0 %vm460_vm1, %v2164_v9  ;;  %2077 = vmatmul.msk.bf16.vlgmr.msra.gmra.mxu3 %vm460_vm1, %v2165_v10 }
 0x219   : > { %v1074_v28 = vpop.permute.xlu0 %1073 }
 0x21a   : > { %v1082_v30 = vsel %vm1081_vm13, %v1074_v28, %v1076_v16  ;;  %v1090_v31 = vsel %vm1081_vm13, %v1076_v16, %v1074_v28  ;;  %2071 = vmatmul.msk.bf16.vlgmr.msra.gmra.mxu1 %vm460_vm1, %v2164_v9  ;;  %2076 = vmatmul.msk.bf16.vlgmr.msra.gmra.mxu2 %vm460_vm1, %v2165_v10  ;;  %v1167_v9 = vld [vmem:[#allocation8 + $0x7] ss:$8 sm:$0x3]  ;;  %v1152_v12 = vpop.permute.xlu2 %1151 }
 0x21b   : > { %v1099_v33 = vmul.f32 %v2827_v18, %v1082_v30  ;;  %v1100_v34 = vmul.f32 %v2829_v19, %v1090_v31  ;;  %v1000_v37 = vpop.permute.xlu1 %999  ;;  %v2877_v10 = vperm.slane %v1167_v9, 0  ;;  %v2879_v11 = vperm.slane %v1167_v9, 1 }
 0x21c   : > { %v1008_v41 = vsel %vm1007_vm14, %v1000_v37, %v1002_v22  ;;  %v1016_v42 = vsel %vm1007_vm14, %v1002_v22, %v1000_v37 }
 0x21d   : > { %v1105_v45 = vpack.c.bf16 %v1101_v26, %v1099_v33  ;;  %v1106_v46 = vpack.c.bf16 %v1102_v29, %v1100_v34  ;;  %v1025_v47 = vmul.f32 %v2833_v23, %v1008_v41  ;;  %v1026_v48 = vmul.f32 %v2835_v24, %v1016_v42 }
 0x21f   : > { %v1031_v49 = vpack.c.bf16 %v1027_v32, %v1025_v47  ;;  %v1032_v50 = vpack.c.bf16 %v1028_v40, %v1026_v48  ;;  %1122 = vmatpush.bf16.msrb.mxu2 %v1105_v45  ;;  %1136 = vmatpush.bf16.msrb.mxu3 %v1106_v46  ;;  %v2168_v32 = vld [vmem:[%s3105_s4 + $0x38] sm:$0xff] }
 0x221   : > { %1048 = vmatpush.bf16.msra.mxu0 %v1031_v49  ;;  %1062 = vmatpush.bf16.msrb.mxu1 %v1032_v50  ;;  %v1224_v56 = vpop.permute.xlu0 %1223 }
 0x222   : > { %v1230_v57 = vsel %vm1229_vm15, %v1222_v55, %v1224_v56  ;;  %v1238_v60 = vsel %vm1229_vm15, %v1224_v56, %v1222_v55 }
 0x223   : > { %v1247_v61 = vmul.f32 %v2853_v51, %v1230_v57  ;;  %v1248_v62 = vmul.f32 %v2855_v52, %v1238_v60  ;;  %v1226_v63 = vpop.permute.xlu1 %1225 }
 0x224   : > { %v1231_v0 = vsel %vm1229_vm15, %v1226_v63, %v2815_v4  ;;  %v1239_v1 = vsel %vm1229_vm15, %v2815_v4, %v1226_v63  ;;  %2082 = vmatmul.msk.bf16.vlgmr.msra.gmra.mxu0 %vm460_vm1, %v2166_v53  ;;  %2089 = vmatmul.msk.bf16.vlgmr.msrb.gmra.mxu3 %vm460_vm1, %v2167_v54 }
 0x225   : > { %v1249_v2 = vmul.f32 %v2853_v51, %v1231_v0  ;;  %v1250_v5 = vmul.f32 %v2855_v52, %v1239_v1 }
 0x227   : > { %v1253_v6 = vpack.c.bf16 %v1249_v2, %v1247_v61  ;;  %v1254_v7 = vpack.c.bf16 %v1250_v5, %v1248_v62 }
 0x229   : > { %1270 = vmatpush.bf16.msra.mxu2 %v1253_v6  ;;  %1284 = vmatpush.bf16.msra.mxu3 %v1254_v7  ;;  %v1148_v8 = vpop.permute.xlu0 %1147 }
 0x22a   : > { %2083 = vmatmul.msk.bf16.vlgmr.msrb.gmra.mxu1 %vm460_vm1, %v2166_v53  ;;  %2088 = vmatmul.msk.bf16.vlgmr.msrb.gmra.mxu2 %vm460_vm1, %v2167_v54 }
 0x22b   : > { %v1150_v4 = vpop.permute.xlu1 %1149 }
 0x22c   : > { %v1156_v16 = vsel %vm1155_vm0, %v1148_v8, %v1150_v4  ;;  %v1164_v17 = vsel %vm1155_vm0, %v1150_v4, %v1148_v8 }
 0x22d   : > { %v1173_v26 = vmul.f32 %v2877_v10, %v1156_v16  ;;  %v1174_v27 = vmul.f32 %v2879_v11, %v1164_v17 }
 0x231   : > { %v1154_v21 = vpop.permute.xlu0 %1153 }
 0x232   : > { %v1157_v22 = vsel %vm1155_vm0, %v1152_v12, %v1154_v21  ;;  %v1165_v25 = vsel %vm1155_vm0, %v1154_v21, %v1152_v12 }
 0x233   : > { %v1175_v28 = vmul.f32 %v2877_v10, %v1157_v22  ;;  %v1176_v29 = vmul.f32 %v2879_v11, %v1165_v25 }
 0x234   : > { %2101 = vmatmul.msk.bf16.vlgmr.msra.gmra.mxu3 %vm460_vm1, %v2169_v20 }
 0x235   : > { %v1179_v30 = vpack.c.bf16 %v1175_v28, %v1173_v26  ;;  %v1180_v31 = vpack.c.bf16 %v1176_v29, %v1174_v27 }
 0x237   : > { %1196 = vmatpush.bf16.msrb.mxu0 %v1179_v30  ;;  %1210 = vmatpush.bf16.msra.mxu1 %v1180_v31 }
 0x23a   : > { %2094 = vmatmul.msk.bf16.vlgmr.msrb.gmra.mxu0 %vm460_vm1, %v2168_v32  ;;  %2095 = vmatmul.msk.bf16.vlgmr.msra.gmra.mxu1 %vm460_vm1, %v2168_v32 }
 0x23b   : > { %2100 = vmatmul.msk.bf16.vlgmr.msra.gmra.mxu2 %vm460_vm1, %v2169_v20 }
 0x277   : > { %v788_v33 = vpop.f32.mrf.mxu3  ;;  %v752_v34 = vpop.f32.mrf.mxu1 }
 0x278   : > { %v789_v0 = vadd.f32 %v788_v33, %v752_v34  ;;  %v1300_v33 = vpop.permute.xlu1 %1299 }
 0x27d   : > { %v766_v37 = vpop.f32.mrf.mxu2 }
 0x27f   : > { %v790_v38 = vpop.f32.mrf.mxu3  ;;  %v754_v39 = vpop.f32.mrf.mxu1 }
 0x280   : > { %v791_v17 = vadd.f32 %v790_v38, %v754_v39 }
 0x285   : > { %v768_v40 = vpop.f32.mrf.mxu2 }
 0x287   : > { %v872_v41 = vpop.f32.mrf.mxu3  ;;  %v802_v42 = vpop.f32.mrf.mxu1 }
 0x288   : > { %v803_v60 = vadd.f32 %v802_v42, %v766_v37 }
 0x28a   : > { %v878_v63 = vadd.f32 %v872_v41, %v803_v60 }
 0x28d   : > { %v858_v43 = vpop.f32.mrf.mxu2 }
 0x28e   : > { %v877_v5 = vadd.f32 %v858_v43, %v789_v0  ;;  %v1305_v0 = vpop.permute.xlu2 %1304 }
 0x28f   : > { %v874_v44 = vpop.f32.mrf.mxu3  ;;  %v804_v45 = vpop.f32.mrf.mxu1 }
 0x290   : > { %v805_v9 = vadd.f32 %v804_v45, %v768_v40 }
 0x291   : > { %v932_v46 = vpop.f32.mrf.mxu0 }
 0x292   : > { %v951_v12 = vadd.f32 %v932_v46, %v877_v5  ;;  %v880_v21 = vadd.f32 %v874_v44, %v805_v9 }
 0x295   : > { %v860_v47 = vpop.f32.mrf.mxu2 }
 0x296   : > { %v879_v25 = vadd.f32 %v860_v47, %v791_v17 }
 0x297   : > { %v990_v48 = vpop.f32.mrf.mxu3  ;;  %v946_v49 = vpop.f32.mrf.mxu1 }
 0x298   : > { %v952_v1 = vadd.f32 %v946_v49, %v878_v63 }
 0x299   : > { %v934_v50 = vpop.f32.mrf.mxu0 }
 0x29a   : > { %v996_v4 = vadd.f32 %v990_v48, %v952_v1  ;;  %v953_v34 = vadd.f32 %v934_v50, %v879_v25 }
 0x29d   : > { %v976_v53 = vpop.f32.mrf.mxu2 }
 0x29e   : > { %v995_v20 = vadd.f32 %v976_v53, %v951_v12 }
 0x29f   : > { %v992_v54 = vpop.f32.mrf.mxu3  ;;  %v948_v55 = vpop.f32.mrf.mxu1 }
 0x2a0   : > { %v954_v26 = vadd.f32 %v948_v55, %v880_v21 }
 0x2a1   : > { %v1050_v57 = vpop.f32.mrf.mxu0 }
 0x2a2   : > { %v1069_v30 = vadd.f32 %v1050_v57, %v995_v20  ;;  %v998_v41 = vadd.f32 %v992_v54, %v954_v26 }
 0x2a5   : > { %v978_v56 = vpop.f32.mrf.mxu2 }
 0x2a6   : > { %v997_v42 = vadd.f32 %v978_v56, %v953_v34 }
 0x2a7   : > { %v1138_v61 = vpop.f32.mrf.mxu3  ;;  %v1064_v62 = vpop.f32.mrf.mxu1 }
 0x2a8   : > { %v1070_v16 = vadd.f32 %v1064_v62, %v996_v4 }
 0x2a9   : > { %v1052_v7 = vpop.f32.mrf.mxu0 }
 0x2aa   : > { %v1144_v27 = vadd.f32 %v1138_v61, %v1070_v16  ;;  %v1071_v48 = vadd.f32 %v1052_v7, %v997_v42  ;;  %v1883_v7 = vld [vmem:[#allocation11] sm:$0xff] }
 0x2ad   : > { %v1124_v2 = vpop.f32.mrf.mxu2 }
 0x2ae   : > { %v1143_v37 = vadd.f32 %v1124_v2, %v1069_v30 }
 0x2af   : > { %v1066_v6 = vpop.f32.mrf.mxu1  ;;  %v1140_v8 = vpop.f32.mrf.mxu3 }
 0x2b0   : > { %v1072_v43 = vadd.f32 %v1066_v6, %v998_v41  ;;  %v2171_v41 = vld [vmem:[%s3107_s6 + $0x8] sm:$0xff] }
 0x2b2   : > { %v1146_v53 = vadd.f32 %v1140_v8, %v1072_v43 }
 0x2b5   : > { %v1126_v22 = vpop.f32.mrf.mxu2 }
 0x2b6   : > { %v1145_v54 = vadd.f32 %v1126_v22, %v1071_v48 }
 0x2b7   : > { %v1198_v28 = vpop.f32.mrf.mxu0  ;;  %v1212_v29 = vpop.f32.mrf.mxu1 }
 0x2b8   : > { %v1218_v31 = vadd.f32 %v1212_v29, %v1144_v27  ;;  %v1286_v32 = vpop.f32.mrf.mxu3  ;;  %v1217_v45 = vadd.f32 %v1198_v28, %v1143_v37 }
 0x2ba   : > { %v1292_v40 = vadd.f32 %v1286_v32, %v1218_v31 }
 0x2bc   : > { %v1308_v38 = vadd.f32 %v1300_v33, %v1292_v40 }
 0x2be   : > { %v1272_v39 = vpop.f32.mrf.mxu2  ;;  %v2899_v44 = vmax.f32 %v1308_v38, 0.0 }
 0x2bf   : > { %v1291_v46 = vadd.f32 %v1272_v39, %v1217_v45  ;;  %v1214_v47 = vpop.f32.mrf.mxu1  ;;  %v1200_v50 = vpop.f32.mrf.mxu0 }
 0x2c0   : > { %1317 = vrot.lane.b32.xlu1 %v2899_v44, %s2491_s25  ;;  %1345 = vrot.lane.b32.xlu0 %v2899_v44, %s2485_s23  ;;  %v1220_v56 = vadd.f32 %v1214_v47, %v1146_v53  ;;  %v1219_v57 = vadd.f32 %v1200_v50, %v1145_v54  ;;  %v1288_v60 = vpop.f32.mrf.mxu3  ;;  %v2170_v50 = vld [vmem:[%s3107_s6] sm:$0xff] }
 0x2c1   : > { %v1307_v49 = vadd.f32 %v1300_v33, %v1291_v46 }
 0x2c2   : > { %v1294_v62 = vadd.f32 %v1288_v60, %v1220_v56 }
 0x2c3   : > { %v2905_v55 = vmax.f32 %v1307_v49, 0.0 }
 0x2c4   : > { %v1310_v1 = vadd.f32 %v1305_v0, %v1294_v62 }
 0x2c5   : > { %1351 = vrot.lane.b32.xlu2 %v2905_v55, %s2485_s23 }
 0x2c6   : > { %v1274_v61 = vpop.f32.mrf.mxu2  ;;  %v2915_v5 = vmax.f32 %v1310_v1, 0.0 }
 0x2c7   : > { %v1293_v63 = vadd.f32 %v1274_v61, %v1219_v57 }
 0x2c8   : > { %1449 = vrot.lane.b32.xlu1 %v2905_v55, %s2492_s11  ;;  %1325 = vrot.lane.b32.xlu0 %v2905_v55, %s2491_s25 }
 0x2c9   : > { %v1309_v2 = vadd.f32 %v1305_v0, %v1293_v63 }
 0x2cb   : > { %v2917_v6 = vmax.f32 %v1309_v2, 0.0 }
 0x2cd   : > { %1443 = vrot.lane.b32.xlu2 %v2899_v44, %s2492_s11 }
 0x2d0   : > { %1347 = vrot.lane.b32.xlu1 %v2915_v5, %s2485_s23  ;;  %1353 = vrot.lane.b32.xlu0 %v2917_v6, %s2485_s23 }
 0x2d5   : > { %1319 = vrot.lane.b32.xlu2 %v2915_v5, %s2491_s25 }
 0x2d8   : > { %1327 = vrot.lane.b32.xlu1 %v2917_v6, %s2491_s25  ;;  %1509 = vrot.lane.b32.xlu0 %v2899_v44, %s2493_s17 }
 0x2dd   : > { %1451 = vrot.lane.b32.xlu2 %v2917_v6, %s2492_s11 }
 0x2e0   : > { %1619 = vrot.lane.b32.xlu1 %v2905_v55, %s2494_s18  ;;  %1445 = vrot.lane.b32.xlu0 %v2915_v5, %s2492_s11 }
 0x2e5   : > { %1515 = vrot.lane.b32.xlu2 %v2905_v55, %s2493_s17 }
 0x2e8   : > { %1511 = vrot.lane.b32.xlu1 %v2915_v5, %s2493_s17  ;;  %1517 = vrot.lane.b32.xlu0 %v2917_v6, %s2493_s17 }
 0x2ed   : > { %1621 = vrot.lane.b32.xlu2 %v2899_v44, %s2494_s18 }
 0x2f0   : > { %1753 = vrot.lane.b32.xlu1 %v2899_v44, %s2489_s21  ;;  %1687 = vrot.lane.b32.xlu0 %v2899_v44, %s2495_s30 }
 0x2f5   : > { %1685 = vrot.lane.b32.xlu2 %v2905_v55, %s2495_s30 }
 0x2f8   : > { %1625 = vrot.lane.b32.xlu1 %v2915_v5, %s2494_s18  ;;  %1623 = vrot.lane.b32.xlu0 %v2917_v6, %s2494_s18 }
 0x2fd   : > { %1691 = vrot.lane.b32.xlu2 %v2915_v5, %s2495_s30 }
 0x300   : > { %1689 = vrot.lane.b32.xlu1 %v2917_v6, %s2495_s30  ;;  %1751 = vrot.lane.b32.xlu0 %v2905_v55, %s2489_s21 }
 0x305   : > { %1755 = vrot.lane.b32.xlu2 %v2917_v6, %s2489_s21 }
 0x308   : > { %1817 = vrot.lane.b32.xlu1 %v2905_v55, %s2496_s13  ;;  %1757 = vrot.lane.b32.xlu0 %v2915_v5, %s2489_s21  ;;  %s2160_s21 = sshll.u32 %s3122_s9, 5 }
 0x309   : > { %s411_s17 = scalar_lea.vmem %s3109_s8, %s2160_s21 }
 0x30d   : > { %1819 = vrot.lane.b32.xlu2 %v2899_v44, %s2496_s13 }
 0x310   : > { %1823 = vrot.lane.b32.xlu1 %v2915_v5, %s2496_s13  ;;  %1821 = vrot.lane.b32.xlu0 %v2917_v6, %s2496_s13 }
 0x315   : > { %1887 = vperm.xlu2 %2279, %v1883_v7  }
 0x31f   : > { %v1352_v8 = vpop.permute.xlu2 %1351 }
 0x327   : > { %v1444_v9 = vpop.permute.xlu2 %1443 }
 0x32f   : > { %v1320_v16 = vpop.permute.xlu2 %1319 }
 0x332   : > { %v1318_v4 = vpop.permute.xlu1 %1317  ;;  %v1346_v12 = vpop.permute.xlu0 %1345 }
 0x333   : > { %v1355_v21 = vsel %vm460_vm1, %v1352_v8, %v1346_v12  ;;  %v1361_v22 = vsel %vm460_vm1, %v1346_v12, %v1352_v8  ;;  %v1577_v8 = vpack.c.bf16 %v2917_v6, %v2905_v55 }
 0x334   : > { %v1363_v30 = vmul.f32 %v1361_v22, %v2757_v13  ;;  %v1364_v31 = vmul.f32 %v1355_v21, %v2759_v14 }
 0x337   : > { %v1452_v27 = vpop.permute.xlu2 %1451 }
 0x33a   : > { %v1450_v17 = vpop.permute.xlu1 %1449  ;;  %v1326_v20 = vpop.permute.xlu0 %1325 }
 0x33b   : > { %v1329_v40 = vsel %vm679_vm10, %v1326_v20, %v1318_v4  ;;  %v1335_v42 = vsel %vm679_vm10, %v1318_v4, %v1326_v20  ;;  %v1453_v54 = vsel %vm817_vm11, %v1450_v17, %v1444_v9  ;;  %v1459_v56 = vsel %vm817_vm11, %v1444_v9, %v1450_v17  ;;  %v2172_v4 = vld [vmem:[%s3107_s6 + $0x10] sm:$0xff] }
 0x33c   : > { %v1338_v39 = vmul.f32 %v1329_v40, %v2761_v15  ;;  %v1461_v61 = vmul.f32 %v1459_v56, %v2781_v35  ;;  %v1462_v62 = vmul.f32 %v1453_v54, %v2783_v36  ;;  %v1578_v9 = vpack.c.bf16 %v2915_v5, %v2899_v44 }
 0x33f   : > { %v1516_v48 = vpop.permute.xlu2 %1515 }
 0x342   : > { %v1348_v25 = vpop.permute.xlu1 %1347  ;;  %v1354_v26 = vpop.permute.xlu0 %1353 }
 0x343   : > { %v1356_v28 = vsel %vm460_vm1, %v1354_v26, %v1348_v25  ;;  %v1362_v29 = vsel %vm460_vm1, %v1348_v25, %v1354_v26  ;;  %v2173_v25 = vld [vmem:[%s3107_s6 + $0x18] sm:$0xff] }
 0x344   : > { %v1365_v32 = vmul.f32 %v1362_v29, %v2757_v13  ;;  %v1366_v33 = vmul.f32 %v1356_v28, %v2759_v14  ;;  %v1337_v14 = vmul.f32 %v1335_v42, %v2748_v3 }
 0x346   : > { %v1369_v34 = vpack.c.bf16 %v1365_v32, %v1363_v30  ;;  %v1370_v37 = vpack.c.bf16 %v1366_v33, %v1364_v31 }
 0x347   : > { %v1622_v7 = vpop.permute.xlu2 %1621 }
 0x348   : > { %1386 = vmatpush.bf16.msra.mxu0 %v1369_v34  ;;  %1400 = vmatpush.bf16.msrb.mxu1 %v1370_v37 }
 0x34a   : > { %v1328_v43 = vpop.permute.xlu1 %1327  ;;  %v1510_v45 = vpop.permute.xlu0 %1509 }
 0x34b   : > { %v1330_v38 = vsel %vm679_vm10, %v1328_v43, %v1320_v16  ;;  %v1336_v13 = vsel %vm679_vm10, %v1320_v16, %v1328_v43  ;;  %2106 = vmatmul.msk.bf16.vlgmr.msra.gmra.mxu0 %vm460_vm1, %v2171_v41  ;;  %2107 = vmatmul.msk.bf16.vlgmr.msrb.gmra.mxu1 %vm460_vm1, %v2171_v41  ;;  %v1884_v43 = vld [vmem:[#allocation11 + $0x8] sm:$0xff] }
 0x34c   : > { %v1339_v46 = vmul.f32 %v1336_v13, %v2748_v3  ;;  %v1340_v47 = vmul.f32 %v1330_v38, %v2761_v15  ;;  %1892 = vperm.xlu0 %2280, %v1884_v43   ;;  %v2175_v13 = vld [vmem:[%s3107_s6 + $0x28] sm:$0xff] }
 0x34e   : > { %v1343_v49 = vpack.c.bf16 %v1339_v46, %v1337_v14  ;;  %v1344_v53 = vpack.c.bf16 %v1340_v47, %v1338_v39 }
 0x34f   : > { %v1686_v26 = vpop.permute.xlu2 %1685 }
 0x350   : > { %1422 = vmatpush.bf16.msrb.mxu2 %v1343_v49  ;;  %1436 = vmatpush.bf16.msrb.mxu3 %v1344_v53 }
 0x352   : > { %v1620_v57 = vpop.permute.xlu1 %1619  ;;  %v1446_v60 = vpop.permute.xlu0 %1445 }
 0x353   : > { %v1454_v3 = vsel %vm817_vm11, %v1452_v27, %v1446_v60  ;;  %v1460_v15 = vsel %vm817_vm11, %v1446_v60, %v1452_v27  ;;  %2112 = vmatmul.msk.bf16.vlgmr.msrb.gmra.mxu2 %vm460_vm1, %v2170_v50  ;;  %2113 = vmatmul.msk.bf16.vlgmr.msrb.gmra.mxu3 %vm460_vm1, %v2170_v50  ;;  %v1635_v29 = vsel %vm1007_vm14, %v1622_v7, %v1620_v57  ;;  %v2176_v60 = vld [vmem:[%s3107_s6 + $0x30] sm:$0xff] }
 0x354   : > { %v1463_v63 = vmul.f32 %v1460_v15, %v2781_v35  ;;  %v1464_v0 = vmul.f32 %v1454_v3, %v2783_v36  ;;  %v1519_v35 = vsel %vm891_vm12, %v1516_v48, %v1510_v45  ;;  %v1525_v36 = vsel %vm891_vm12, %v1510_v45, %v1516_v48 }
 0x355   : > { %v1527_v44 = vmul.f32 %v1525_v36, %v2801_v59  ;;  %v1528_v5 = vmul.f32 %v1519_v35, %v2803_v58  ;;  %v1638_v37 = vmul.f32 %v1635_v29, %v2835_v24 }
 0x356   : > { %v1467_v1 = vpack.c.bf16 %v1463_v63, %v1461_v61  ;;  %v1468_v2 = vpack.c.bf16 %v1464_v0, %v1462_v62 }
 0x357   : > { %v1692_v41 = vpop.permute.xlu2 %1691 }
 0x358   : > { %1484 = vmatpush.bf16.msrb.mxu0 %v1467_v1  ;;  %1498 = vmatpush.bf16.msra.mxu1 %v1468_v2 }
 0x35a   : > { %v1512_v12 = vpop.permute.xlu1 %1511  ;;  %v1518_v16 = vpop.permute.xlu0 %1517 }
 0x35b   : > { %v1520_v17 = vsel %vm891_vm12, %v1518_v16, %v1512_v12  ;;  %v1526_v55 = vsel %vm891_vm12, %v1512_v12, %v1518_v16  ;;  %2118 = vmatmul.msk.bf16.vlgmr.msrb.gmra.mxu0 %vm460_vm1, %v2172_v4  ;;  %2119 = vmatmul.msk.bf16.vlgmr.msra.gmra.mxu1 %vm460_vm1, %v2172_v4 }
 0x35c   : > { %1594 = vmatpush.bf16.msra.mxu0 %v1577_v8  ;;  %1608 = vmatpush.bf16.msrb.mxu1 %v1578_v9  ;;  %v1529_v6 = vmul.f32 %v1526_v55, %v2801_v59  ;;  %v1530_v20 = vmul.f32 %v1520_v17, %v2803_v58  ;;  %v2174_v59 = vld [vmem:[%s3107_s6 + $0x20] sm:$0xff]  ;;  %v1627_v58 = vsel %vm1007_vm14, %v1620_v57, %v1622_v7  ;;  %v2177_v9 = vld [vmem:[%s3107_s6 + $0x38] sm:$0xff] }
 0x35d   : > { %v1637_v34 = vmul.f32 %v1627_v58, %v2833_v23 }
 0x35e   : > { %v1533_v21 = vpack.c.bf16 %v1529_v6, %v1527_v44  ;;  %v1534_v22 = vpack.c.bf16 %v1530_v20, %v1528_v5 }
 0x35f   : > { %v1756_v54 = vpop.permute.xlu2 %1755 }
 0x360   : > { %1550 = vmatpush.bf16.msra.mxu2 %v1533_v21  ;;  %1564 = vmatpush.bf16.msra.mxu3 %v1534_v22  ;;  %v2178_v21 = vld [vmem:[%s3107_s6 + $0x40] sm:$0xff] }
 0x362   : > { %v1754_v27 = vpop.permute.xlu1 %1753  ;;  %v1688_v28 = vpop.permute.xlu0 %1687 }
 0x363   : > { %2124 = vmatmul.msk.bf16.vlgmr.msra.gmra.mxu2 %vm460_vm1, %v2173_v25  ;;  %2125 = vmatmul.msk.bf16.vlgmr.msra.gmra.mxu3 %vm460_vm1, %v2173_v25  ;;  %v1693_v14 = vsel %vm1081_vm13, %v1686_v26, %v1688_v28  ;;  %v1701_v39 = vsel %vm1081_vm13, %v1688_v28, %v1686_v26 }
 0x364   : > { %v1703_v48 = vmul.f32 %v1693_v14, %v2827_v18  ;;  %v1704_v49 = vmul.f32 %v1701_v39, %v2829_v19 }
 0x367   : > { %v1820_v4 = vpop.permute.xlu2 %1819 }
 0x36a   : > { %v1626_v30 = vpop.permute.xlu1 %1625  ;;  %v1624_v31 = vpop.permute.xlu0 %1623 }
 0x36b   : > { %v1628_v32 = vsel %vm1007_vm14, %v1624_v31, %v1626_v30  ;;  %v1636_v33 = vsel %vm1007_vm14, %v1626_v30, %v1624_v31  ;;  %2130 = vmatmul.msk.bf16.vlgmr.msra.gmra.mxu0 %vm460_vm1, %v2174_v59  ;;  %2131 = vmatmul.msk.bf16.vlgmr.msrb.gmra.mxu1 %vm460_vm1, %v2174_v59 }
 0x36c   : > { %v1639_v40 = vmul.f32 %v1628_v32, %v2833_v23  ;;  %v1640_v42 = vmul.f32 %v1636_v33, %v2835_v24 }
 0x36e   : > { %v1643_v45 = vpack.c.bf16 %v1639_v40, %v1637_v34  ;;  %v1644_v38 = vpack.c.bf16 %v1640_v42, %v1638_v37 }
 0x370   : > { %1660 = vmatpush.bf16.msrb.mxu2 %v1643_v45  ;;  %1674 = vmatpush.bf16.msrb.mxu3 %v1644_v38 }
 0x372   : > { %v1690_v46 = vpop.permute.xlu1 %1689  ;;  %v1752_v23 = vpop.permute.xlu0 %1751 }
 0x373   : > { %v1694_v24 = vsel %vm1081_vm13, %v1690_v46, %v1692_v41  ;;  %v1702_v47 = vsel %vm1081_vm13, %v1692_v41, %v1690_v46  ;;  %2136 = vmatmul.msk.bf16.vlgmr.msrb.gmra.mxu2 %vm460_vm1, %v2175_v13  ;;  %2137 = vmatmul.msk.bf16.vlgmr.msrb.gmra.mxu3 %vm460_vm1, %v2175_v13  ;;  %v1759_v3 = vsel %vm1155_vm0, %v1752_v23, %v1754_v27 }
 0x374   : > { %v1705_v53 = vmul.f32 %v1694_v24, %v2827_v18  ;;  %v1706_v50 = vmul.f32 %v1702_v47, %v2829_v19  ;;  %v1767_v15 = vsel %vm1155_vm0, %v1754_v27, %v1752_v23  ;;  %v1769_v63 = vmul.f32 %v1759_v3, %v2877_v10 }
 0x375   : > { %v1770_v0 = vmul.f32 %v1767_v15, %v2879_v11 }
 0x376   : > { %v1709_v56 = vpack.c.bf16 %v1705_v53, %v1703_v48  ;;  %v1710_v57 = vpack.c.bf16 %v1706_v50, %v1704_v49 }
 0x378   : > { %1726 = vmatpush.bf16.msrb.mxu0 %v1709_v56  ;;  %1740 = vmatpush.bf16.msra.mxu1 %v1710_v57 }
 0x37a   : > { %v1818_v61 = vpop.permute.xlu1 %1817  ;;  %v1758_v62 = vpop.permute.xlu0 %1757 }
 0x37b   : > { %v1760_v18 = vsel %vm1155_vm0, %v1756_v54, %v1758_v62  ;;  %v1768_v19 = vsel %vm1155_vm0, %v1758_v62, %v1756_v54  ;;  %2142 = vmatmul.msk.bf16.vlgmr.msrb.gmra.mxu0 %vm460_vm1, %v2176_v60  ;;  %2143 = vmatmul.msk.bf16.vlgmr.msra.gmra.mxu1 %vm460_vm1, %v2176_v60  ;;  %v1825_v35 = vsel %vm1229_vm15, %v1818_v61, %v1820_v4 }
 0x37c   : > { %v1771_v1 = vmul.f32 %v1760_v18, %v2877_v10  ;;  %v1772_v2 = vmul.f32 %v1768_v19, %v2879_v11  ;;  %v1833_v36 = vsel %vm1229_vm15, %v1820_v4, %v1818_v61  ;;  %v1835_v17 = vmul.f32 %v1825_v35, %v2853_v51 }
 0x37d   : > { %v1836_v55 = vmul.f32 %v1833_v36, %v2855_v52 }
 0x37e   : > { %v1775_v7 = vpack.c.bf16 %v1771_v1, %v1769_v63  ;;  %v1776_v8 = vpack.c.bf16 %v1772_v2, %v1770_v0 }
 0x380   : > { %1792 = vmatpush.bf16.msra.mxu2 %v1775_v7  ;;  %1806 = vmatpush.bf16.msra.mxu3 %v1776_v8 }
 0x382   : > { %v1824_v12 = vpop.permute.xlu1 %1823  ;;  %v1822_v16 = vpop.permute.xlu0 %1821 }
 0x383   : > { %v1826_v10 = vsel %vm1229_vm15, %v1822_v16, %v1824_v12  ;;  %v1834_v11 = vsel %vm1229_vm15, %v1824_v12, %v1822_v16  ;;  %2148 = vmatmul.msk.bf16.vlgmr.msra.gmra.mxu2 %vm460_vm1, %v2177_v9  ;;  %2149 = vmatmul.msk.bf16.vlgmr.msra.gmra.mxu3 %vm460_vm1, %v2177_v9 }
 0x384   : > { %v1837_v44 = vmul.f32 %v1826_v10, %v2853_v51  ;;  %v1838_v5 = vmul.f32 %v1834_v11, %v2855_v52  ;;  %v1888_v11 = vpop.permute.xlu2 %1887 }
 0x386   : > { %v1841_v6 = vpack.c.bf16 %v1837_v44, %v1835_v17  ;;  %v1842_v20 = vpack.c.bf16 %v1838_v5, %v1836_v55 }
 0x388   : > { %1858 = vmatpush.bf16.msra.mxu0 %v1841_v6  ;;  %1872 = vmatpush.bf16.msrb.mxu1 %v1842_v20 }
 0x38b   : > { %2154 = vmatmul.msk.bf16.vlgmr.msra.gmra.mxu0 %vm460_vm1, %v2178_v21  ;;  %2155 = vmatmul.msk.bf16.vlgmr.msrb.gmra.mxu1 %vm460_vm1, %v2178_v21 }
 0x3c8   : > { %v1388_v22 = vpop.f32.mrf.mxu0  ;;  %v1402_v25 = vpop.f32.mrf.mxu1 }
 0x3d0   : > { %v1390_v26 = vpop.f32.mrf.mxu0  ;;  %v1404_v51 = vpop.f32.mrf.mxu1 }
 0x3d6   : > { %v1424_v27 = vpop.f32.mrf.mxu2  ;;  %v1438_v52 = vpop.f32.mrf.mxu3 }
 0x3d7   : > { %v1425_v45 = vadd.f32 %v1424_v27, %v1388_v22  ;;  %v1439_v38 = vadd.f32 %v1438_v52, %v1402_v25 }
 0x3d8   : > { %v1486_v28 = vpop.f32.mrf.mxu0  ;;  %v1500_v59 = vpop.f32.mrf.mxu1 }
 0x3d9   : > { %v1505_v46 = vadd.f32 %v1486_v28, %v1425_v45  ;;  %v1506_v24 = vadd.f32 %v1500_v59, %v1439_v38  ;;  %v1893_v28 = vpop.permute.xlu0 %1892 }
 0x3de   : > { %v1426_v58 = vpop.f32.mrf.mxu2  ;;  %v1440_v29 = vpop.f32.mrf.mxu3 }
 0x3df   : > { %v1427_v49 = vadd.f32 %v1426_v58, %v1390_v26  ;;  %v1441_v53 = vadd.f32 %v1440_v29, %v1404_v51 }
 0x3e0   : > { %v1488_v30 = vpop.f32.mrf.mxu0  ;;  %v1502_v31 = vpop.f32.mrf.mxu1 }
 0x3e1   : > { %v1507_v3 = vadd.f32 %v1488_v30, %v1427_v49  ;;  %v1508_v62 = vadd.f32 %v1502_v31, %v1441_v53 }
 0x3e6   : > { %v1552_v32 = vpop.f32.mrf.mxu2  ;;  %v1566_v33 = vpop.f32.mrf.mxu3 }
 0x3e7   : > { %v1571_v47 = vadd.f32 %v1552_v32, %v1505_v46  ;;  %v1572_v48 = vadd.f32 %v1566_v33, %v1506_v24 }
 0x3e8   : > { %v1596_v34 = vpop.f32.mrf.mxu0  ;;  %v1610_v37 = vpop.f32.mrf.mxu1 }
 0x3e9   : > { %v1615_v54 = vadd.f32 %v1596_v34, %v1571_v47  ;;  %v1616_v57 = vadd.f32 %v1610_v37, %v1572_v48 }
 0x3ee   : > { %v1554_v41 = vpop.f32.mrf.mxu2  ;;  %v1568_v40 = vpop.f32.mrf.mxu3 }
 0x3ef   : > { %v1573_v19 = vadd.f32 %v1554_v41, %v1507_v3  ;;  %v1574_v63 = vadd.f32 %v1568_v40, %v1508_v62 }
 0x3f0   : > { %v1598_v42 = vpop.f32.mrf.mxu0  ;;  %v1612_v43 = vpop.f32.mrf.mxu1 }
 0x3f1   : > { %v1617_v7 = vadd.f32 %v1598_v42, %v1573_v19  ;;  %v1618_v4 = vadd.f32 %v1612_v43, %v1574_v63 }
 0x3f6   : > { %v1662_v13 = vpop.f32.mrf.mxu2  ;;  %v1676_v14 = vpop.f32.mrf.mxu3 }
 0x3f7   : > { %v1681_v15 = vadd.f32 %v1662_v13, %v1615_v54  ;;  %v1682_v18 = vadd.f32 %v1676_v14, %v1616_v57 }
 0x3f8   : > { %v1728_v39 = vpop.f32.mrf.mxu0  ;;  %v1742_v23 = vpop.f32.mrf.mxu1 }
 0x3f9   : > { %v1747_v0 = vadd.f32 %v1728_v39, %v1681_v15  ;;  %v1748_v1 = vadd.f32 %v1742_v23, %v1682_v18 }
 0x3fe   : > { %v1664_v50 = vpop.f32.mrf.mxu2  ;;  %v1678_v56 = vpop.f32.mrf.mxu3 }
 0x3ff   : > { %v1683_v12 = vadd.f32 %v1664_v50, %v1617_v7  ;;  %v1684_v17 = vadd.f32 %v1678_v56, %v1618_v4 }
 0x400   : > { %v1730_v60 = vpop.f32.mrf.mxu0  ;;  %v1744_v61 = vpop.f32.mrf.mxu1 }
 0x401   : > { %v1749_v6 = vadd.f32 %v1730_v60, %v1683_v12  ;;  %v1750_v21 = vadd.f32 %v1744_v61, %v1684_v17 }
 0x406   : > { %v1794_v2 = vpop.f32.mrf.mxu2  ;;  %v1808_v9 = vpop.f32.mrf.mxu3 }
 0x407   : > { %v1813_v8 = vadd.f32 %v1794_v2, %v1747_v0  ;;  %v1814_v35 = vadd.f32 %v1808_v9, %v1748_v1 }
 0x408   : > { %v1860_v36 = vpop.f32.mrf.mxu0  ;;  %v1874_v10 = vpop.f32.mrf.mxu1 }
 0x409   : > { %v1879_v16 = vadd.f32 %v1860_v36, %v1813_v8  ;;  %v1880_v55 = vadd.f32 %v1874_v10, %v1814_v35 }
 0x40b   : > { %v1895_v44 = vadd.f32 %v1888_v11, %v1879_v16  ;;  %v1896_v5 = vadd.f32 %v1888_v11, %v1880_v55 }
 0x40d   : > { %v1899_v20 = vmax.f32 %v1895_v44, 0.0  ;;  %v1900_v22 = vmax.f32 %v1896_v5, 0.0 }
 0x40e   : > { %v1796_v25 = vpop.f32.mrf.mxu2  ;;  %v1810_v51 = vpop.f32.mrf.mxu3 }
 0x40f   : > { %1903 = vst [vmem:[%s411_s17] sm:$0xff] %v1899_v20  ;;  %v1815_v26 = vadd.f32 %v1796_v25, %v1749_v6  ;;  %v1816_v27 = vadd.f32 %v1810_v51, %v1750_v21 }
 0x410   : > { %1904 = vst [vmem:[%s411_s17 + $0x8] sm:$0xff] %v1900_v22  ;;  %v1862_v52 = vpop.f32.mrf.mxu0  ;;  %v1876_v58 = vpop.f32.mrf.mxu1 }
 0x411   : > { %v1881_v59 = vadd.f32 %v1862_v52, %v1815_v26  ;;  %v1882_v29 = vadd.f32 %v1876_v58, %v1816_v27 }
 0x413   : > { %v1897_v30 = vadd.f32 %v1893_v28, %v1881_v59  ;;  %v1898_v31 = vadd.f32 %v1893_v28, %v1882_v29 }
 0x415   : > { %v1901_v32 = vmax.f32 %v1897_v30, 0.0  ;;  %v1902_v33 = vmax.f32 %v1898_v31, 0.0 }
 0x417   : > { %1905 = vst [vmem:[%s411_s17 + $0x10] sm:$0xff] %v1901_v32 }
 0x418   : > { %1906 = vst [vmem:[%s411_s17 + $0x18] sm:$0xff] %v1902_v33 }
 0x419 PF: > { %s3116_s9 = smov %s2623_s27  ;;  %p20_p4 = scmp.ge.s32.totalorder %s2613_s22, 4  }
 0x41a   : > { %s3117_s27 = smov %s2465_s28  ;;  %s3118_s28 = smov %s2469_s29 }
 0x41b   : > { %s3119_s29 = smov %s3116_s9  ;;  %s3120_s30 = smov %s2613_s22 }
 0x41c   :  { %22 = sbr.rel (!%p20_p4) target bundleno = 5 (0x5), region = 125 }
 0x421   :  { %1928 = vsyncpa [#allocation5], 1 }
 0x422   :  { %1930 = vsyncpa [#allocation5 + $0x1], 1 }
 0x423   :  { %1931 = vsyncpa [#allocation7], 1 }
 0x424   :  { %1932 = vsyncpa [#allocation10], 1 }

</bundles_post_ra>
